<compile_context>
chip_gen: v7x
topology: tpu7x:2x2x1
jax: 0.10.0
libtpu: 0.0.40
codegen_flags: <defaults>
</compile_context>

<pallas_src>
import functools

import jax
import jax.numpy as jnp
from jax.experimental import pallas as pl
from jax.experimental.pallas import tpu as pltpu


# ----------------------------------------------------------------------------
# Kernel 1: fused relu + dropout + input projection (single lane-dense GEMM)
# ----------------------------------------------------------------------------
def relu_dropout_proj_kernel(x_ref, scale_ref, w_ref, b_ref, o_ref):
    # relu + inverted dropout (scale is {0, 1/(1-p)} in train, 1.0 in eval).
    x = jnp.maximum(x_ref[...], 0.0) * scale_ref[...]
    # x @ [W_ih_fwd | W_ih_bwd] (gates [r|z|n] per direction) + b_ih, all at once.
    o_ref[...] = (jnp.dot(x, w_ref[...], preferred_element_type=jnp.float32)
                  + b_ref[...])


def _row_block(rows, max_rows=512):
    """Largest row tile <= max_rows dividing `rows` (multiple of 8 preferred)."""
    if rows <= max_rows:
        return rows
    for cand in range(max_rows, 7, -1):
        if rows % cand == 0 and cand % 8 == 0:
            return cand
    for cand in range(max_rows, 0, -1):
        if rows % cand == 0:
            return cand
    return rows


def relu_dropout_proj(x, scale, w_ih, b_ih):
    """x, scale: (R, E).  w_ih: (E, 6H).  b_ih: (1, 6H).  Returns (R, 6H) f32."""
    R, E = x.shape
    G = w_ih.shape[-1]
    rblk = _row_block(R)
    return pl.pallas_call(
        relu_dropout_proj_kernel,
        out_shape=jax.ShapeDtypeStruct((R, G), jnp.float32),
        grid_spec=pltpu.PrefetchScalarGridSpec(
            num_scalar_prefetch=0,
            grid=(R // rblk,),
            in_specs=[pl.BlockSpec((rblk, E), lambda r: (r, 0)),
                      pl.BlockSpec((rblk, E), lambda r: (r, 0)),
                      pl.BlockSpec((E, G), lambda r: (0, 0)),
                      pl.BlockSpec((1, G), lambda r: (0, 0))],
            out_specs=pl.BlockSpec((rblk, G), lambda r: (r, 0))),
        compiler_params=pltpu.CompilerParams(
            dimension_semantics=("parallel",)),
    )(x, scale, w_ih, b_ih)


# ----------------------------------------------------------------------------
# Kernel 2: bidirectional GRU recurrence, grid = (direction, time).
# Only h @ W_hh stays on the sequential critical path; x-gates were precomputed
# by kernel 1.  Backward direction handled purely via reversed index_maps.
# ----------------------------------------------------------------------------
def bigru_kernel(gx_ref, whh_ref, bhh_ref, out_ref, hfin_ref, h_scr):
    t = pl.program_id(1)

    @pl.when(t == 0)
    def _():
        h_scr[...] = jnp.zeros_like(h_scr)          # PyTorch default h0 = 0

    h = h_scr[...]                                  # (B, H)
    H = h.shape[-1]
    gx = gx_ref[0]                                  # (B, 3H): x@W_ih + b_ih (this dir/step)
    gh = (jnp.dot(h, whh_ref[0], preferred_element_type=jnp.float32)
          + bhh_ref[0])                             # (B, 3H): h@W_hh + b_hh, one fused GEMM

    r = jax.nn.sigmoid(gx[:, :H] + gh[:, :H])
    z = jax.nn.sigmoid(gx[:, H:2 * H] + gh[:, H:2 * H])
    n = jnp.tanh(gx[:, 2 * H:] + r * gh[:, 2 * H:])
    h_new = (1.0 - z) * n + z * h

    h_scr[...] = h_new
    out_ref[0] = jnp.maximum(h_new, 0.0)            # fused F.relu(GRU_out)
    # Written every step (last write wins under constant-block revisiting), so
    # we do not rely on "only the last step writes" semantics.
    hfin_ref[0] = h_new


def bigru(gates_x, w_hh, b_hh):
    """gates_x: (T, B, 6H) time-major (fwd gates in [:3H], bwd gates in [3H:]).
    w_hh: (2, H, 3H).  b_hh: (2, 1, 3H).
    Returns (relu(GRU_out) (T, B, 2H), h_final (2, B, H))."""
    T, B, G = gates_x.shape
    H = w_hh.shape[1]
    assert G == 6 * H

    def time_idx(d, t):
        # forward (d=0): t ; backward (d=1): T-1-t  (reversed walk, no HBM reverse)
        return d * (T - 1) + (1 - 2 * d) * t

    # NOTE: for production H, cast w_hh/gates to bf16 (f32 accumulate) and/or
    # single-buffer the constant weight blocks (pl.Buffered(1)) to cut resident
    # VMEM on v7x.  Kept f32 here for simplicity at demo sizes.
    return pl.pallas_call(
        bigru_kernel,
        out_shape=(jax.ShapeDtypeStruct((T, B, 2 * H), jnp.float32),
                   jax.ShapeDtypeStruct((2, B, H), jnp.float32)),
        grid_spec=pltpu.PrefetchScalarGridSpec(
            num_scalar_prefetch=0,
            grid=(2, T),
            in_specs=[
                # this direction's precomputed input gates for this time step
                pl.BlockSpec((1, B, 3 * H), lambda d, t: (time_idx(d, t), 0, d)),
                # constant-index weight/bias blocks (fetched once per direction)
                pl.BlockSpec((1, H, 3 * H), lambda d, t: (d, 0, 0)),
                pl.BlockSpec((1, 1, 3 * H), lambda d, t: (d, 0, 0)),
            ],
            out_specs=[
                # write straight into this direction's half of the 2H output slab
                pl.BlockSpec((1, B, H), lambda d, t: (time_idx(d, t), 0, d)),
                pl.BlockSpec((1, B, H), lambda d, t: (d, 0, 0)),
            ],
            scratch_shapes=[pltpu.VMEM((B, H), jnp.float32)]),
        compiler_params=pltpu.CompilerParams(
            # direction axis independent -> parallel (2 TCs on v7x);
            # time axis carries the recurrence -> arbitrary.
            dimension_semantics=("parallel", "arbitrary")),
    )(gates_x, w_hh, b_hh)


# ----------------------------------------------------------------------------
# Parameter init (PyTorch-shaped, then re-laid-out gate-stacked for the kernels)
# ----------------------------------------------------------------------------
def init_params(key, vocab_size, embedding_size, hid, dec_hid):
    ks = jax.random.split(key, 11)
    bound = 1.0 / float(hid) ** 0.5

    def unif(k, shape, b):
        return jax.random.uniform(k, shape, jnp.float32, minval=-b, maxval=b)

    # nn.Embedding(vocab, E, padding_idx=0): N(0,1), row 0 zeroed.
    emb = jax.random.normal(ks[0], (vocab_size, embedding_size), jnp.float32)
    emb = emb.at[0].set(0.0)

    def gru_dir(k0, k1, k2, k3):
        # PyTorch layout: weight_ih (3H, E), weight_hh (3H, H), gates [r, z, n].
        w_ih = unif(k0, (3 * hid, embedding_size), bound)
        w_hh = unif(k1, (3 * hid, hid), bound)
        b_ih = unif(k2, (3 * hid,), bound)
        b_hh = unif(k3, (3 * hid,), bound)
        # kernel layout: (E, 3H), (H, 3H), (1, 3H) — gates stacked along lanes.
        return w_ih.T, w_hh.T, b_ih.reshape(1, 3 * hid), b_hh.reshape(1, 3 * hid)

    wih_f, whh_f, bih_f, bhh_f = gru_dir(ks[1], ks[2], ks[3], ks[4])
    wih_b, whh_b, bih_b, bhh_b = gru_dir(ks[5], ks[6], ks[7], ks[8])

    fc_bound = 1.0 / float(2 * hid) ** 0.5
    w_fc = unif(ks[9], (dec_hid, 2 * hid), fc_bound)    # nn.Linear(2H, dec_hid)
    b_fc = unif(ks[10], (dec_hid,), fc_bound)

    return {
        'embedding': emb,
        # both directions' input projections stacked lane-dense: (E, 6H)
        'w_ih': jnp.concatenate([wih_f, wih_b], axis=1),
        'b_ih': jnp.concatenate([bih_f, bih_b], axis=1),    # (1, 6H)
        # recurrent weights stacked per direction: (2, H, 3H), (2, 1, 3H)
        'w_hh': jnp.stack([whh_f, whh_b], axis=0),
        'b_hh': jnp.stack([bhh_f, bhh_b], axis=0),
        'w_fc_t': w_fc.T,                                   # (2H, dec_hid)
        'b_fc': b_fc.reshape(1, dec_hid),
    }


# ----------------------------------------------------------------------------
# Forward pass (glue in plain JAX, hot paths in the kernels above)
# ----------------------------------------------------------------------------
@functools.partial(jax.jit, static_argnames=('train',))
def encoder_lstm_forward(input_word, params, dropout_key=None, train=True):
    # input_word: (B, S) int32
    S = input_word.shape[1]
    E = params['embedding'].shape[1]
    H = params['w_hh'].shape[1]

    # Embedding lookup (gather) — glue.  Transpose the *ids* (cheap) so all
    # downstream tensors are already time-major (no HBM transpose of the
    # embedded activations).
    ids_tm = jnp.transpose(input_word)                           # (S, B)
    emb_tm = jnp.take(params['embedding'], ids_tm, axis=0)       # (S, B, E)
    B = emb_tm.shape[1]
    x_flat = emb_tm.reshape(S * B, E)

    # Dropout keep/scale mask from jax.random (traced key -> no recompiles).
    # TODO(synk): torch's dropout RNG stream cannot be reproduced bit-exactly;
    # the stateful TPU PRNG (pltpu.prng_*) has no CPU/interpret lowering, so the
    # mask is drawn here and streamed into the fused kernel instead.
    if train:
        keep = jax.random.bernoulli(dropout_key, 0.5, x_flat.shape)
        scale = keep.astype(jnp.float32) * 2.0                   # inverted dropout, p=0.5
    else:
        scale = jnp.ones_like(x_flat)

    # Kernel 1: relu + dropout + both directions' input projections in one GEMM.
    gates = relu_dropout_proj(x_flat, scale, params['w_ih'], params['b_ih'])
    gates = gates.reshape(S, B, 6 * H)                           # (T, B, 6H)

    # Kernel 2: bidirectional GRU recurrence (+ fused relu on the outputs).
    out_tm, h_fin = bigru(gates, params['w_hh'], params['b_hh'])

    # batch_first layout, matching PyTorch GRU(batch_first=True) output
    gru_out = jnp.transpose(out_tm, (1, 0, 2))                   # (B, S, 2H)

    # hidden = tanh(fc(cat(hidden[-2], hidden[-1])))  — tiny; left to XLA per
    # the perf review (kernel launch + DMA overhead would exceed the compute).
    hcat = jnp.concatenate([h_fin[0], h_fin[1]], axis=-1)        # (B, 2H)
    hidden = jnp.tanh(hcat @ params['w_fc_t'] + params['b_fc'])  # (B, dec_hid)

    return gru_out, hidden


if __name__ == "__main__":
    key = jax.random.PRNGKey(0)
    k_param, k_ids, k_drop = jax.random.split(key, 3)

    # Small, hardware-tile-aligned demo shapes (B multiple of 8 sublanes,
    # H/E multiples of 128 lanes — per perf review; real model uses E=H=300).
    B, S = 8, 12
    VOCAB = 20
    E, H = 128, 128                   # embedding_size / encoder_hid_dem (scaled)
    DEC = 3 * H                       # decoder_hid_dem = 3 * encoder_hid_dem

    params = init_params(k_param, VOCAB, E, H, DEC)
    input_word = jax.random.randint(k_ids, (B, S), 0, VOCAB, dtype=jnp.int32)

    gru_out, hidden = encoder_lstm_forward(input_word, params, k_drop, train=True)
    gru_out, hidden = jax.block_until_ready((gru_out, hidden))

    assert gru_out.shape == (B, S, 2 * H), gru_out.shape
    assert hidden.shape == (B, DEC), hidden.shape
    assert bool(jnp.all(jnp.isfinite(gru_out)))
    assert bool(jnp.all(jnp.isfinite(hidden)))
    print("KERNEL_OK")
</pallas_src>

<mosaic_0001>
module attributes {stable_mosaic.version = 11 : i64} {
  func.func @bigru_kernel(%arg0: i32, %arg1: i32, %arg2: memref<1x8x384xf32, #tpu.memory_space<vmem>>, %arg3: memref<1x128x384xf32, #tpu.memory_space<vmem>>, %arg4: memref<1x1x384xf32, #tpu.memory_space<vmem>>, %arg5: memref<1x8x128xf32, #tpu.memory_space<vmem>>, %arg6: memref<1x8x128xf32, #tpu.memory_space<vmem>>, %arg7: memref<8x128xf32, #tpu.memory_space<vmem>>) attributes {dimension_semantics = [#tpu.dimension_semantics<parallel>, #tpu.dimension_semantics<arbitrary>], iteration_bounds = array<i64: 2, 12>, scalar_prefetch = 0 : i64, scratch_operands = 1 : i64, tpu.core_type = #tpu.core_type<tc>, window_params = [{transform_indices = @transform_0, window_bounds = array<i64: 1, 8, 384>}, {transform_indices = @transform_1, window_bounds = array<i64: 1, 128, 384>}, {transform_indices = @transform_2, window_bounds = array<i64: 1, 1, 384>}, {transform_indices = @transform_3, window_bounds = array<i64: 1, 8, 128>}, {transform_indices = @transform_4, window_bounds = array<i64: 1, 8, 128>}]} {
    %c0_i32 = arith.constant 0 : i32
    %0 = arith.cmpi eq, %arg1, %c0_i32 : i32
    %1 = arith.extui %0 : i1 to i32
    %c0_i32_0 = arith.constant 0 : i32
    %2 = arith.cmpi ne, %1, %c0_i32_0 : i32
    scf.if %2 {
      %cst_23 = arith.constant 0.000000e+00 : f32
      %48 = vector.broadcast %cst_23 : f32 to vector<8x128xf32>
      %c0_24 = arith.constant 0 : index
      %c0_25 = arith.constant 0 : index
      %49 = vector.load %arg7[%c0_24, %c0_25] : memref<8x128xf32, #tpu.memory_space<vmem>>, vector<8x128xf32>
      tpu.vector_store %arg7[%c0_24, %c0_25], %48 {strides = array<i32>} : memref<8x128xf32, #tpu.memory_space<vmem>>, vector<8x128xf32>,
    } else {
    }
    %c0 = arith.constant 0 : index
    %c0_1 = arith.constant 0 : index
    %3 = vector.load %arg7[%c0, %c0_1] : memref<8x128xf32, #tpu.memory_space<vmem>>, vector<8x128xf32>
    %c0_2 = arith.constant 0 : index
    %c0_3 = arith.constant 0 : index
    %c0_4 = arith.constant 0 : index
    %4 = vector.load %arg2[%c0_2, %c0_3, %c0_4] : memref<1x8x384xf32, #tpu.memory_space<vmem>>, vector<1x8x384xf32>
    %5 = vector.shape_cast %4 : vector<1x8x384xf32> to vector<8x384xf32>
    %c0_5 = arith.constant 0 : index
    %c0_6 = arith.constant 0 : index
    %c0_7 = arith.constant 0 : index
    %6 = vector.load %arg3[%c0_5, %c0_6, %c0_7] : memref<1x128x384xf32, #tpu.memory_space<vmem>>, vector<1x128x384xf32>
    %7 = vector.shape_cast %6 : vector<1x128x384xf32> to vector<128x384xf32>
    %cst = arith.constant dense<0.000000e+00> : vector<8x384xf32>
    %8 = tpu.matmul %3, %7, %cst {dimension_numbers = #tpu.dot_dimension_numbers<[1], [0], [0], [1], [0, 0, 1, 1], [], []>} : vector<8x128xf32>, vector<128x384xf32>, vector<8x384xf32> -> vector<8x384xf32>
    %c0_8 = arith.constant 0 : index
    %c0_9 = arith.constant 0 : index
    %c0_10 = arith.constant 0 : index
    %9 = vector.load %arg4[%c0_8, %c0_9, %c0_10] : memref<1x1x384xf32, #tpu.memory_space<vmem>>, vector<1x1x384xf32>
    %10 = vector.shape_cast %9 : vector<1x1x384xf32> to vector<1x384xf32>
    %11 = vector.broadcast %10 : vector<1x384xf32> to vector<8x384xf32>
    %12 = arith.addf %8, %11 : vector<8x384xf32>
    %13 = vector.extract_strided_slice %5 {offsets = [0, 0], sizes = [8, 128], strides = [1, 1]} : vector<8x384xf32> to vector<8x128xf32>
    %14 = vector.extract_strided_slice %12 {offsets = [0, 0], sizes = [8, 128], strides = [1, 1]} : vector<8x384xf32> to vector<8x128xf32>
    %15 = arith.addf %13, %14 : vector<8x128xf32>
    %16 = arith.negf %15 : vector<8x128xf32>
    %17 = math.exp %16 : vector<8x128xf32>
    %cst_11 = arith.constant 1.000000e+00 : f32
    %18 = vector.broadcast %cst_11 : f32 to vector<8x128xf32>
    %19 = arith.addf %18, %17 : vector<8x128xf32>
    %20 = arith.divf %18, %19 : vector<8x128xf32>
    %21 = vector.extract_strided_slice %5 {offsets = [0, 128], sizes = [8, 128], strides = [1, 1]} : vector<8x384xf32> to vector<8x128xf32>
    %22 = vector.extract_strided_slice %12 {offsets = [0, 128], sizes = [8, 128], strides = [1, 1]} : vector<8x384xf32> to vector<8x128xf32>
    %23 = arith.addf %21, %22 : vector<8x128xf32>
    %24 = arith.negf %23 : vector<8x128xf32>
    %25 = math.exp %24 : vector<8x128xf32>
    %cst_12 = arith.constant 1.000000e+00 : f32
    %26 = vector.broadcast %cst_12 : f32 to vector<8x128xf32>
    %27 = arith.addf %26, %25 : vector<8x128xf32>
    %28 = arith.divf %26, %27 : vector<8x128xf32>
    %29 = vector.extract_strided_slice %5 {offsets = [0, 256], sizes = [8, 128], strides = [1, 1]} : vector<8x384xf32> to vector<8x128xf32>
    %30 = vector.extract_strided_slice %12 {offsets = [0, 256], sizes = [8, 128], strides = [1, 1]} : vector<8x384xf32> to vector<8x128xf32>
    %31 = arith.mulf %20, %30 : vector<8x128xf32>
    %32 = arith.addf %29, %31 : vector<8x128xf32>
    %33 = math.tanh %32 : vector<8x128xf32>
    %cst_13 = arith.constant 1.000000e+00 : f32
    %34 = vector.broadcast %cst_13 : f32 to vector<8x128xf32>
    %35 = arith.subf %34, %28 : vector<8x128xf32>
    %36 = arith.mulf %35, %33 : vector<8x128xf32>
    %37 = arith.mulf %28, %3 : vector<8x128xf32>
    %38 = arith.addf %36, %37 : vector<8x128xf32>
    %c0_14 = arith.constant 0 : index
    %c0_15 = arith.constant 0 : index
    %39 = vector.load %arg7[%c0_14, %c0_15] : memref<8x128xf32, #tpu.memory_space<vmem>>, vector<8x128xf32>
    tpu.vector_store %arg7[%c0_14, %c0_15], %38 {strides = array<i32>} : memref<8x128xf32, #tpu.memory_space<vmem>>, vector<8x128xf32>,
    %cst_16 = arith.constant 0.000000e+00 : f32
    %40 = vector.broadcast %cst_16 : f32 to vector<8x128xf32>
    %41 = arith.maximumf %38, %40 : vector<8x128xf32>
    %c0_17 = arith.constant 0 : index
    %c0_18 = arith.constant 0 : index
    %c0_19 = arith.constant 0 : index
    %42 = vector.load %arg5[%c0_17, %c0_18, %c0_19] : memref<1x8x128xf32, #tpu.memory_space<vmem>>, vector<1x8x128xf32>
    %43 = vector.shape_cast %42 : vector<1x8x128xf32> to vector<8x128xf32>
    %44 = vector.shape_cast %41 : vector<8x128xf32> to vector<1x8x128xf32>
    tpu.vector_store %arg5[%c0_17, %c0_18, %c0_19], %44 {strides = array<i32>} : memref<1x8x128xf32, #tpu.memory_space<vmem>>, vector<1x8x128xf32>,
    %c0_20 = arith.constant 0 : index
    %c0_21 = arith.constant 0 : index
    %c0_22 = arith.constant 0 : index
    %45 = vector.load %arg6[%c0_20, %c0_21, %c0_22] : memref<1x8x128xf32, #tpu.memory_space<vmem>>, vector<1x8x128xf32>
    %46 = vector.shape_cast %45 : vector<1x8x128xf32> to vector<8x128xf32>
    %47 = vector.shape_cast %38 : vector<8x128xf32> to vector<1x8x128xf32>
    tpu.vector_store %arg6[%c0_20, %c0_21, %c0_22], %47 {strides = array<i32>} : memref<1x8x128xf32, #tpu.memory_space<vmem>>, vector<1x8x128xf32>,
    return
  }
  func.func @transform_0(%arg0: i32, %arg1: i32) -> (i32, i32, i32) {
    %c11_i32 = arith.constant 11 : i32
    %0 = arith.muli %arg0, %c11_i32 : i32
    %c2_i32 = arith.constant 2 : i32
    %1 = arith.muli %c2_i32, %arg0 : i32
    %c1_i32 = arith.constant 1 : i32
    %2 = arith.subi %c1_i32, %1 : i32
    %3 = arith.muli %2, %arg1 : i32
    %4 = arith.addi %0, %3 : i32
    %c0_i32 = arith.constant 0 : i32
    %c0_i32_0 = arith.constant 0 : i32
    return %4, %c0_i32, %arg0 : i32, i32, i32
  }
  func.func @transform_1(%arg0: i32, %arg1: i32) -> (i32, i32, i32) {
    %c0_i32 = arith.constant 0 : i32
    %c0_i32_0 = arith.constant 0 : i32
    %c0_i32_1 = arith.constant 0 : i32
    return %arg0, %c0_i32, %c0_i32_0 : i32, i32, i32
  }
  func.func @transform_2(%arg0: i32, %arg1: i32) -> (i32, i32, i32) {
    %c0_i32 = arith.constant 0 : i32
    %c0_i32_0 = arith.constant 0 : i32
    %c0_i32_1 = arith.constant 0 : i32
    return %arg0, %c0_i32, %c0_i32_0 : i32, i32, i32
  }
  func.func @transform_3(%arg0: i32, %arg1: i32) -> (i32, i32, i32) {
    %c11_i32 = arith.constant 11 : i32
    %0 = arith.muli %arg0, %c11_i32 : i32
    %c2_i32 = arith.constant 2 : i32
    %1 = arith.muli %c2_i32, %arg0 : i32
    %c1_i32 = arith.constant 1 : i32
    %2 = arith.subi %c1_i32, %1 : i32
    %3 = arith.muli %2, %arg1 : i32
    %4 = arith.addi %0, %3 : i32
    %c0_i32 = arith.constant 0 : i32
    %c0_i32_0 = arith.constant 0 : i32
    return %4, %c0_i32, %arg0 : i32, i32, i32
  }
  func.func @transform_4(%arg0: i32, %arg1: i32) -> (i32, i32, i32) {
    %c0_i32 = arith.constant 0 : i32
    %c0_i32_0 = arith.constant 0 : i32
    %c0_i32_1 = arith.constant 0 : i32
    return %arg0, %c0_i32, %c0_i32_0 : i32, i32, i32
  }
}

module attributes {stable_mosaic.version = 11 : i64} {
  func.func @relu_dropout_proj_kernel(%arg0: i32, %arg1: memref<96x128xf32, #tpu.memory_space<vmem>>, %arg2: memref<96x128xf32, #tpu.memory_space<vmem>>, %arg3: memref<128x768xf32, #tpu.memory_space<vmem>>, %arg4: memref<1x768xf32, #tpu.memory_space<vmem>>, %arg5: memref<96x768xf32, #tpu.memory_space<vmem>>) attributes {dimension_semantics = [#tpu.dimension_semantics<parallel>], iteration_bounds = array<i64: 1>, scalar_prefetch = 0 : i64, scratch_operands = 0 : i64, tpu.core_type = #tpu.core_type<tc>, window_params = [{transform_indices = @transform_0, window_bounds = array<i64: 96, 128>}, {transform_indices = @transform_1, window_bounds = array<i64: 96, 128>}, {pipeline_mode = #tpu.pipeline_mode<synchronous>, transform_indices = @transform_2, window_bounds = array<i64: 128, 768>}, {pipeline_mode = #tpu.pipeline_mode<synchronous>, transform_indices = @transform_3, window_bounds = array<i64: 1, 768>}, {transform_indices = @transform_4, window_bounds = array<i64: 96, 768>}]} {
    %c0 = arith.constant 0 : index
    %c0_0 = arith.constant 0 : index
    %0 = vector.load %arg1[%c0, %c0_0] : memref<96x128xf32, #tpu.memory_space<vmem>>, vector<96x128xf32>
    %cst = arith.constant 0.000000e+00 : f32
    %1 = vector.broadcast %cst : f32 to vector<96x128xf32>
    %2 = arith.maximumf %0, %1 : vector<96x128xf32>
    %c0_1 = arith.constant 0 : index
    %c0_2 = arith.constant 0 : index
    %3 = vector.load %arg2[%c0_1, %c0_2] : memref<96x128xf32, #tpu.memory_space<vmem>>, vector<96x128xf32>
    %4 = arith.mulf %2, %3 : vector<96x128xf32>
    %c0_3 = arith.constant 0 : index
    %c0_4 = arith.constant 0 : index
    %5 = vector.load %arg3[%c0_3, %c0_4] : memref<128x768xf32, #tpu.memory_space<vmem>>, vector<128x768xf32>
    %cst_5 = arith.constant dense<0.000000e+00> : vector<96x768xf32>
    %6 = tpu.matmul %4, %5, %cst_5 {dimension_numbers = #tpu.dot_dimension_numbers<[1], [0], [0], [1], [0, 0, 1, 1], [], []>} : vector<96x128xf32>, vector<128x768xf32>, vector<96x768xf32> -> vector<96x768xf32>
    %c0_6 = arith.constant 0 : index
    %c0_7 = arith.constant 0 : index
    %7 = vector.load %arg4[%c0_6, %c0_7] : memref<1x768xf32, #tpu.memory_space<vmem>>, vector<1x768xf32>
    %8 = vector.broadcast %7 : vector<1x768xf32> to vector<96x768xf32>
    %9 = arith.addf %6, %8 : vector<96x768xf32>
    %c0_8 = arith.constant 0 : index
    %c0_9 = arith.constant 0 : index
    %10 = vector.load %arg5[%c0_8, %c0_9] : memref<96x768xf32, #tpu.memory_space<vmem>>, vector<96x768xf32>
    tpu.vector_store %arg5[%c0_8, %c0_9], %9 {strides = array<i32>} : memref<96x768xf32, #tpu.memory_space<vmem>>, vector<96x768xf32>,
    return
  }
  func.func @transform_0(%arg0: i32) -> (i32, i32) {
    %c0_i32 = arith.constant 0 : i32
    %c0_i32_0 = arith.constant 0 : i32
    return %arg0, %c0_i32 : i32, i32
  }
  func.func @transform_1(%arg0: i32) -> (i32, i32) {
    %c0_i32 = arith.constant 0 : i32
    %c0_i32_0 = arith.constant 0 : i32
    return %arg0, %c0_i32 : i32, i32
  }
  func.func @transform_2(%arg0: i32) -> (i32, i32) {
    %c0_i32 = arith.constant 0 : i32
    %c0_i32_0 = arith.constant 0 : i32
    %c0_i32_1 = arith.constant 0 : i32
    return %c0_i32, %c0_i32_0 : i32, i32
  }
  func.func @transform_3(%arg0: i32) -> (i32, i32) {
    %c0_i32 = arith.constant 0 : i32
    %c0_i32_0 = arith.constant 0 : i32
    %c0_i32_1 = arith.constant 0 : i32
    return %c0_i32, %c0_i32_0 : i32, i32
  }
  func.func @transform_4(%arg0: i32) -> (i32, i32) {
    %c0_i32 = arith.constant 0 : i32
    %c0_i32_0 = arith.constant 0 : i32
    return %arg0, %c0_i32 : i32, i32
  }
}

</mosaic_0001>

<bundles_post_ra>
// kernel: encoder_lstm_forward.3
= control target key start
LH: loop header
LB: loop body
LE: loop exit
PB: predicated region body
PF: predicated region fallthrough
CT: control target
= control target key end

     0   :  { %10 = vsyncpa [#allocation4], 0  ;;  %s1305_s0 = inlined_call_operand.vmem [shape: f32[12,8,768], index: 0, kind: input, shape index: {}]   ;;  %s1306_s1 = inlined_call_operand.vmem [shape: f32[2,128,384], index: 1, kind: input, shape index: {}]   ;;  %s1307_s2 = inlined_call_operand.vmem [shape: f32[2,1,384], index: 2, kind: input, shape index: {}]   ;;  %s1308_s3 = inlined_call_operand.hbm [shape: f32[12,8,256], index: 3, kind: output, shape index: {0}]   ;;  %s1309_s4 = inlined_call_operand.vmem [shape: f32[2,8,128], index: 4, kind: output, shape index: {1}]  }
   0x1   :  { %12 = vsyncpa [#allocation4 + $0x1], 0  ;;  %s1065_s15 = smov 0   ;;  %s1067_s16 = smov 0  }
   0x2   :  { %s1069_s17 = smov 0   ;;  %s1071_s18 = smov 0  }
   0x3   :  { %s1073_s19 = smov 0   ;;  %s1075_s20 = smov 0  }
   0x4   :  { %s1077_s21 = smov 0   ;;  %s1079_s22 = smov 0  }
   0x5 LB: > { %1320 = sst [smem:[#allocation6_spill]] %s1005_s15  ;;  %s720_s23 = sadd.s32 4294967295, %s1033_s22   ;;  %s1033_s22 = sphi %s1079_s22, %s18_s22   ;;  %s1029_s21 = sphi %s1077_s21, %s1340_s21   ;;  %s1025_s20 = sphi %s1075_s20, %s1339_s20   ;;  %s1021_s19 = sphi %s1073_s19, %s1338_s19   ;;  %s1017_s18 = sphi %s1071_s18, %s1337_s18   ;;  %s1013_s17 = sphi %s1069_s17, %s1343_s17   ;;  %s1009_s16 = sphi %s1067_s16, %s1342_s16   ;;  %s1005_s15 = sphi %s1065_s15, %s1341_s15  }
   0x6   : > { %1321 = sst [smem:[#allocation7_spill]] %s1013_s17  ;;  %s721_s24 = sadd.s32 4294967294, %s1033_s22  }
   0x7   : > { %1322 = sst [smem:[#allocation8_spill]] %s1025_s20  ;;  %s27_s25 = sadd.s32 1, %s1025_s20 }
   0x8   : > { %1323 = sst [smem:[#allocation9_spill]] %s1029_s21  ;;  %p28_p0 = scmp.ge.s32.totalorder %s27_s25, 12 }
   0x9   : > { %1324 = sst [smem:[#allocation10_spill]] %s1033_s22  ;;  %s30_s26 = sadd.s32 1, %s1029_s21 }
   0xa   : > { %s124_s27 = smul.u32 11, %s1029_s21  ;;  %s724_s28 = sshll.u32 %s1029_s21, 1 }
   0xb   : > { %s1345_s25 = smov (%p28_p0, %s27_s25), 0  ;;  %s1347_s26 = smov (!%p28_p0, %s30_s26), %s1029_s21 }
   0xc   : > { %1325 = sst [smem:[#allocation11_spill]] %s1345_s25  ;;  %s126_s29 = ssub.s32 1, %s724_s28 }
   0xd   : > { %p149_p1 = scmp.ne.s32.totalorder %s1013_s17, %s1009_s16  ;;  %p32_p2 = scmp.ge.s32.totalorder %s1347_s26, 2 }
   0xe   : > { %s127_s30 = smul.u32 %s1025_s20, %s126_s29  ;;  %p150_p3 = scmp.eq.s32.totalorder %s720_s23, 23 }
   0xf   : > { %p155_p4 = scmp.ne.s32.totalorder %s1009_s16, %s1005_s15  ;;  %s1349_s26 = smov (%p32_p2, %s1347_s26), 0 }
  0x10   : > { %1326 = sst [smem:[#allocation12_spill]] %s1349_s26  ;;  %s128_s5 = sadd.s32 %s127_s30, %s124_s27 }
  0x11   : > { %p1121_p5 = por %p150_p3, %p149_p1  ;;  %s129_s7 = smul.u32 11, %s1349_s26 }
  0x12   : > { %s725_s8 = sshll.u32 %s1349_s26, 1  ;;  %s135_s10 = ssub.s32 %s1029_s21, %s1349_s26 }
  0x13   : > { %s131_s9 = ssub.s32 1, %s725_s8  ;;  %p156_p6 = scmp.eq.s32.totalorder %s721_s24, 23 }
  0x14   : > { %s132_s11 = smul.u32 %s131_s9, %s1345_s25  ;;  %p728_p7 = scmp.ge.s32.totalorder %s1033_s22, 1 }
  0x15   : > { %p238_p8 = scmp.lt.s32.totalorder %s1033_s22, 25  ;;  %p1135_p9 = por %p156_p6, %p155_p4 }
  0x16   : > { %s133_s12 = sadd.s32 %s132_s11, %s129_s7  ;;  %s139_s27 = sadd.s32 1, %s1013_s17 }
  0x17   : > { %s1328_s13 = scalar_select %p1135_p9, 1, 0 }
  0x18   : > { %s134_s14 = ssub.s32 %s128_s5, %s133_s12  ;;  %p239_p10 = pnand %p728_p7, %p238_p8 }
  0x19   : > { %1329 = sst [smem:[#allocation13_spill]] %s1328_s13  ;;  %s136_s23 = sor.u32 %s135_s10, %s134_s14 }
  0x1a   : > { %p137_p11 = scmp.eq.s32.totalorder %s136_s23, 0  ;;  %242 = sbr.rel (%p239_p10) target bundleno = 362 (0x16a), region = 32 }
  0x1b   : > { %s1310_s24 = sand.u32 (!%p239_p10), 1, %s1009_s16   ;;  %s286_s29 = smul.u32 (!%p239_p10), 11, %s1021_s19 }
  0x1c   : > { %s1141_s28 = scalar_select %p137_p11, %s1013_s17, %s139_s27  }
  0x1d   : > { %s1147_s30 = sshll.u32 (!%p239_p10), %s1310_s24, 3  ;;  %s730_s5 = sshll.u32 (!%p239_p10), %s1021_s19, 1 }
  0x1e   : > { %1330 = sst [smem:[#allocation14_spill]] %s1141_s28  ;;  %s288_s7 = ssub.s32 (!%p239_p10), 1, %s730_s5 }
  0x1f   : > { %s289_s8 = smul.u32 (!%p239_p10), %s1017_s18, %s288_s7  ;;  %p306_p12 = scmp.lt.s32.totalorder (!%p239_p10), %s1021_s19, 1 }
  0x20   : > { %s291_s9 = smul.u32 (!%p239_p10), 3, %s1021_s19  ;;  %s279_s26 = scalar_lea.vmem (!%p239_p10), [#allocation3], %s1147_s30 }
  0x21   : > { %s1153_s10 = sadd.s32 %s289_s8, %s286_s29  ;;  %p734_p1 = scmp.ne.s32.totalorder %s1017_s18, 0 }
  0x22   : > { %p292_p13 = scmp.lt.s32.totalorder %s1153_s10, 11  ;;  %p294_p0 = scmp.lt.s32.totalorder %s291_s9, 5  ;;  %v1035_v0 = vmov (!%p734_p1), 0.0  }
  0x23   : > { %s307_s11 = scalar_select %p306_p12, %s1021_s19, 1 }
  0x24   : > { %s293_s12 = scalar_select %p292_p13, %s1153_s10, 11 }
  0x25   : > { %s1351_s9 = smov (!%p294_p0, %s291_s9), 5  ;;  %s733_s23 = sshll.u32 %s307_s11, 3  ;;  %328 = vst [vmem:[#allocation2] sm:$0xff] (!%p734_p1), %v1035_v0 }
  0x26   : > { %s851_s14 = smul.u32 6, %s293_s12  ;;  %s1161_s5 = scalar_lea.vmem %s1309_s4, %s733_s23 }
  0x27   : > { %s852_s27 = smul.u32 384, %s307_s11 }
  0x28   : > { %s297_s7 = sadd.s32 %s851_s14, %s1351_s9  ;;  %s853_s25 = smul.u32 3, %s307_s11 }
  0x29   : > { %s731_s29 = sshll.u32 %s297_s7, 3  ;;  %s1166_s20 = scalar_lea.vmem %s1306_s1, %s852_s27 }
  0x2a   : > { %s1171_s13 = scalar_lea.vmem %s1305_s0, %s731_s29  ;;  %s1176_s22 = scalar_lea.vmem %s1307_s2, %s853_s25 }
  0x2b   : > { %327 = sbr.rel (%p734_p1) target bundleno = 50 (0x32), region = 36 }
  0x32 PF: > { %v334_v1 = vld [vmem:[%s1166_s20 + $0x8] sm:$0xff]  ;;  %v337_v2 = vld [vmem:[%s1166_s20 + $0x20] sm:$0xff]  ;;  %v336_v5 = vld [vmem:[%s1166_s20 + $0x18] sm:$0xff]  ;;  %v1036_v8 = vmov 0.0|0.0   ;;  %v1037_v9 = vmov 0.0   ;;  %vm1038_vm0 = vmmov 0  }
  0x33   : > { %v333_v3 = vld [vmem:[%s1166_s20] sm:$0xff]  ;;  %v795_v4 = vpack.c.bf16 %v337_v2, %v334_v1  ;;  %v340_v6 = vld [vmem:[%s1166_s20 + $0x38] sm:$0xff]  ;;  %v343_v7 = vld [vmem:[%s1166_s20 + $0x50] sm:$0xff]  ;;  %827 = vmatprep.subr.bf16.mxu1 %v1036_v8  ;;  %462 = vmatprep.mubr.f32.mxu0 %v1037_v9  ;;  %s739_s15 = sshll.u32 %s1153_s10, 1  ;;  %s1039_s24 = smov [#allocation3]  }
  0x34   : > { %v797_v10 = vpack.c.bf16 %v336_v5, %v333_v3  ;;  %v799_v11 = vpack.c.bf16 %v343_v7, %v340_v6  ;;  %v339_v12 = vld [vmem:[%s1166_s20 + $0x30] sm:$0xff]  ;;  %v342_v13 = vld [vmem:[%s1166_s20 + $0x48] sm:$0xff]  ;;  %792 = vmatprep.mubr.msk.f32.mxu1 %vm1038_vm0, %v1037_v9  ;;  %v349_v15 = vld [vmem:[%s1166_s20 + $0x80] sm:$0xff]  ;;  %s585_s17 = sadd.s32 %s1021_s19, %s739_s15  ;;  %s1331_s19 = sand.u32 1, %s1009_s16  }
  0x35   : > { %v346_v14 = vld [vmem:[%s1166_s20 + $0x68] sm:$0xff]  ;;  %796 = vmatprep.subr.bf16.mxu0 %v795_v4  ;;  %v801_v16 = vpack.c.bf16 %v342_v13, %v339_v12  ;;  %v345_v18 = vld [vmem:[%s1166_s20 + $0x60] sm:$0xff]  ;;  %v348_v19 = vld [vmem:[%s1166_s20 + $0x78] sm:$0xff]  ;;  %v383_v13 = vlaneseq  ;;  %s740_s18 = sshll.u32 %s585_s17, 7  ;;  %s943_s9 = sshll.u32 %s1039_s24, 4  ;;  %s944_s9 = int_to_ptr.vmem [resolvable:$false] %s943_s9 }
  0x36   : > { %798 = vmatpush1.bf16.msra.mxu0 %v797_v10  ;;  %v803_v17 = vpack.c.bf16 %v349_v15, %v346_v14  ;;  %v352_v20 = vld [vmem:[%s1166_s20 + $0x98] sm:$0xff]  ;;  %v355_v21 = vld [vmem:[%s1166_s20 + $0xb0] sm:$0xff]  ;;  %v805_v22 = vpack.c.bf16 %v348_v19, %v345_v18  ;;  %v354_v25 = vld [vmem:[%s1166_s20 + $0xa8] sm:$0xff]  ;;  %s1248_s25 = scalar_lea.hbm %s1308_s3, %s740_s18  ;;  %s945_s10 = scalar_lea.vmem %s944_s9, 256 }
  0x37   : > { %800 = vmatprep.subr.bf16.mxu0 %v799_v11  ;;  %v807_v23 = vpack.c.bf16 %v355_v21, %v352_v20  ;;  %v351_v24 = vld [vmem:[%s1166_s20 + $0x90] sm:$0xff]  ;;  %v358_v26 = vld [vmem:[%s1166_s20 + $0xc8] sm:$0xff]  ;;  %v361_v27 = vld [vmem:[%s1166_s20 + $0xe0] sm:$0xff]  ;;  %v384_v14 = vshrl.u32 %v383_v13, 7 }
  0x38   : > { %v335_v28 = vld [vmem:[%s1166_s20 + $0x10] sm:$0xff]  ;;  %v338_v29 = vld [vmem:[%s1166_s20 + $0x28] sm:$0xff]  ;;  %v341_v31 = vld [vmem:[%s1166_s20 + $0x40] sm:$0xff]  ;;  %v809_v32 = vpack.c.bf16 %v354_v25, %v351_v24  ;;  %v811_v34 = vpack.c.bf16 %v361_v27, %v358_v26 }
  0x39   : > { %v828_v30 = vpack.c.bf16 %v338_v29, %v335_v28  ;;  %v344_v33 = vld [vmem:[%s1166_s20 + $0x58] sm:$0xff]  ;;  %v357_v35 = vld [vmem:[%s1166_s20 + $0xc0] sm:$0xff]  ;;  %v367_v39 = vld [vmem:[%s1166_s20 + $0x110] sm:$0xff]  ;;  %v385_v15 = vsub.s32 0, %v384_v14 }
  0x3a   : > { %802 = vmatpush1.bf16.msra.mxu0 %v801_v16  ;;  %v360_v36 = vld [vmem:[%s1166_s20 + $0xd8] sm:$0xff]  ;;  %v831_v38 = vpack.c.bf16 %v344_v33, %v341_v31  ;;  %v347_v40 = vld [vmem:[%s1166_s20 + $0x70] sm:$0xff]  ;;  %v350_v41 = vld [vmem:[%s1166_s20 + $0x88] sm:$0xff]  ;;  %v393_v33 = vsub.s32 2, %v384_v14 }
  0x3b   : > { %804 = vmatprep.subr.bf16.mxu0 %v803_v17  ;;  %v364_v37 = vld [vmem:[%s1166_s20 + $0xf8] sm:$0xff]  ;;  %829 = vmatpush3.bf16.msra.mxu1 %v828_v30  ;;  %v813_v42 = vpack.c.bf16 %v360_v36, %v357_v35  ;;  %v363_v44 = vld [vmem:[%s1166_s20 + $0xf0] sm:$0xff]  ;;  %v366_v45 = vld [vmem:[%s1166_s20 + $0x108] sm:$0xff]  ;;  %v834_v47 = vpack.c.bf16 %v350_v41, %v347_v40  ;;  %v389_v17 = vsub.s32 1, %v384_v14 }
  0x3c   : > { %830 = vmatprep.subr.bf16.mxu1 %v1036_v8  ;;  %v815_v43 = vpack.c.bf16 %v367_v39, %v364_v37  ;;  %v370_v46 = vld [vmem:[%s1166_s20 + $0x128] sm:$0xff]  ;;  %v373_v48 = vld [vmem:[%s1166_s20 + $0x140] sm:$0xff]  ;;  %v356_v50 = vld [vmem:[%s1166_s20 + $0xb8] sm:$0xff]  ;;  %v817_v51 = vpack.c.bf16 %v366_v45, %v363_v44 }
  0x3d   : > { %v353_v49 = vld [vmem:[%s1166_s20 + $0xa0] sm:$0xff]  ;;  %v819_v52 = vpack.c.bf16 %v373_v48, %v370_v46  ;;  %v372_v54 = vld [vmem:[%s1166_s20 + $0x138] sm:$0xff]  ;;  %v379_v57 = vld [vmem:[%s1166_s20 + $0x170] sm:$0xff] }
  0x3e   : > { %806 = vmatpush1.bf16.msra.mxu0 %v805_v22  ;;  %v369_v53 = vld [vmem:[%s1166_s20 + $0x120] sm:$0xff]  ;;  %v376_v55 = vld [vmem:[%s1166_s20 + $0x158] sm:$0xff]  ;;  %v837_v56 = vpack.c.bf16 %v356_v50, %v353_v49  ;;  %v359_v58 = vld [vmem:[%s1166_s20 + $0xd0] sm:$0xff] }
  0x3f   : > { %808 = vmatprep.subr.bf16.mxu0 %v807_v23  ;;  %832 = vmatpush3.bf16.msra.mxu1 %v831_v38  ;;  %v362_v59 = vld [vmem:[%s1166_s20 + $0xe8] sm:$0xff]  ;;  %v821_v60 = vpack.c.bf16 %v372_v54, %v369_v53  ;;  %v823_v61 = vpack.c.bf16 %v379_v57, %v376_v55  ;;  %v375_v62 = vld [vmem:[%s1166_s20 + $0x150] sm:$0xff]  ;;  %v365_v1 = vld [vmem:[%s1166_s20 + $0x100] sm:$0xff] }
  0x40   : > { %833 = vmatprep.subr.bf16.mxu1 %v1036_v8  ;;  %v378_v63 = vld [vmem:[%s1166_s20 + $0x168] sm:$0xff]  ;;  %v840_v0 = vpack.c.bf16 %v362_v59, %v359_v58  ;;  %v368_v2 = vld [vmem:[%s1166_s20 + $0x118] sm:$0xff]  ;;  %v371_v5 = vld [vmem:[%s1166_s20 + $0x130] sm:$0xff] }
  0x41   : > { %v825_v3 = vpack.c.bf16 %v378_v63, %v375_v62  ;;  %v843_v4 = vpack.c.bf16 %v368_v2, %v365_v1  ;;  %v374_v6 = vld [vmem:[%s1166_s20 + $0x148] sm:$0xff]  ;;  %v329_v7 = vld [vmem:[#allocation2] sm:$0xff]  ;;  %v380_v11 = vld [vmem:[%s1166_s20 + $0x178] sm:$0xff] }
  0x42   : > { %810 = vmatpush1.bf16.msra.mxu0 %v809_v32  ;;  %v846_v9 = vpack.c.bf16 %v374_v6, %v371_v5  ;;  %v377_v10 = vld [vmem:[%s1166_s20 + $0x160] sm:$0xff]  ;;  %v331_v26 = vld [vmem:[%s1171_s13 + $0x8] sm:$0xff]  ;;  %v332_v39 = vld [vmem:[%s1171_s13 + $0x10] sm:$0xff]  ;;  %s589_s20 = sshll.u32 %s279_s26, 4  ;;  %s1250_s20 = int_to_ptr.vmem [resolvable:$true] %s589_s20 }
  0x43   : > { %812 = vmatprep.subr.bf16.mxu0 %v811_v34  ;;  %835 = vmatpush3.bf16.msra.mxu1 %v834_v47  ;;  %v849_v12 = vpack.c.bf16 %v380_v11, %v377_v10  ;;  %v381_v16 = vld [vmem:[%s1176_s22] sm:$0x7]  ;;  %s939_s28 = scalar_lea.vmem %s1250_s20, 128  ;;  %p946_p6 = scmp.lt.s32.totalorder %s1250_s20, %s944_s9 }
  0x44   : > { %836 = vmatprep.subr.bf16.mxu1 %v1036_v8  ;;  %v386_v18 = vrot.slane %v381_v16, %v385_v15  ;;  %v390_v19 = vrot.slane %v381_v16, %v389_v17  ;;  %v330_v20 = vld [vmem:[%s1171_s13] sm:$0xff]  ;;  %v394_v34 = vrot.slane %v381_v16, %v393_v33  ;;  %s565_s13 = scalar_lea.sflag [#allocation4], %s1331_s19  ;;  %p940_p2 = scmp.ne.s32.totalorder %s1250_s20, %s939_s28 }
  0x45   : > { %p947_p7 = scmp.lt.s32.totalorder %s945_s10, %s939_s28 }
  0x46   : > { %814 = vmatpush1.bf16.msra.mxu0 %v813_v42  ;;  %p941_p3 = pnand %p940_p2, %p1121_p5 }
  0x47   : > { %816 = vmatprep.subr.bf16.mxu0 %v815_v43  ;;  %838 = vmatpush3.bf16.msra.mxu1 %v837_v56  ;;  %p948_p8 = por %p947_p7, %p946_p6 }
  0x48   : > { %839 = vmatprep.subr.bf16.mxu1 %v1036_v8  ;;  %p942_p4 = pneg %p941_p3 }
  0x4a   : > { %818 = vmatpush1.bf16.msra.mxu0 %v817_v51  ;;  %p949_p10 = pnand %p948_p8, %p942_p4 }
  0x4b   : > { %820 = vmatprep.subr.bf16.mxu0 %v819_v52  ;;  %841 = vmatpush3.bf16.msra.mxu1 %v840_v0 }
  0x4c   : > { %842 = vmatprep.subr.bf16.mxu1 %v1036_v8 }
  0x4e   : > { %822 = vmatpush1.bf16.msra.mxu0 %v821_v60 }
  0x4f   : > { %824 = vmatprep.subr.bf16.mxu0 %v823_v61  ;;  %844 = vmatpush3.bf16.msra.mxu1 %v843_v4 }
  0x50   : > { %845 = vmatprep.subr.bf16.mxu1 %v1036_v8 }
  0x52   : > { %826 = vmatpush1.bf16.msra.mxu0 %v825_v3 }
  0x53   : > { %847 = vmatpush3.bf16.msra.mxu1 %v846_v9 }
  0x54   : > { %848 = vmatprep.subr.bf16.mxu1 %v1036_v8 }
  0x55   : > { %463 = vmatmul.mubr.f32.vlgmr.msra.gmra.mrb[0].mxu0 %v329_v7 }
  0x57   : > { %850 = vmatpush3.bf16.msra.mxu1 %v849_v12 }
  0x5a   : > { %793 = vmatmul.mubr.f32.vlgmr.msra.gmra.mrb[0].mxu1 %v329_v7 }
 0x128   : > { %v464_v21 = vpop.f32.mrb[0].mxu0 }
 0x129   : > { %v465_v22 = vadd.f32 %v464_v21, %v386_v18  ;;  %v466_v23 = vpop.f32.mrb[1].mxu0 }
 0x12a   : > { %v467_v24 = vadd.f32 %v466_v23, %v390_v19 }
 0x12b   : > { %v539_v25 = vadd.f32 %v465_v22, %v330_v20 }
 0x12c   : > { %v546_v8 = vadd.f32 %v467_v24, %v331_v26 }
 0x12d   : > { %v735_v27 = vmul.f32 -1.442695, %v539_v25  ;;  %v535_v28 = vpop.f32.mrb[0].mxu1 }
 0x12e   : > { %v736_v29 = vmul.f32 -1.442695, %v546_v8  ;;  %v794_v30 = vpop.f32.mrb[1].mxu1  ;;  %v536_v37 = vadd.f32 %v535_v28, %v394_v34 }
 0x12f   : > { %929 = vpow2.f32 %v735_v27 }
 0x130   : > { %931 = vpow2.f32 %v736_v29 }
 0x139   : > { %v930_v31 = vpop.eup %929 }
 0x13a   : > { %v543_v32 = vadd.f32 1.0, %v930_v31  ;;  %v932_v35 = vpop.eup %931 }
 0x13b   : > { %v550_v36 = vadd.f32 1.0, %v932_v35 }
 0x13c   : > { %933 = vrcp.f32 %v543_v32 }
 0x13d   : > { %935 = vrcp.f32 %v550_v36 }
 0x146   : > { %v934_v38 = vpop.eup %933 }
 0x147   : > { %v553_v40 = vmul.f32 %v934_v38, %v536_v37  ;;  %v936_v42 = vpop.eup %935 }
 0x148   : > { %v556_v43 = vsub.f32 1.0, %v936_v42  ;;  %v558_v46 = vmul.f32 %v936_v42, %v329_v7 }
 0x149   : > { %v554_v41 = vadd.f32 %v553_v40, %v332_v39 }
 0x14b   : > { %937 = vtanh.f32 %v554_v41 }
 0x155   : > { %v938_v44 = vpop.eup %937 }
 0x156   : > { %v557_v45 = vmul.f32 %v938_v44, %v556_v43 }
 0x158   : > { %v559_v47 = vadd.f32 %v558_v46, %v557_v45 }
 0x15a   : > { %560 = vst [vmem:[#allocation2] sm:$0xff] %v559_v47  ;;  %v561_v48 = vmax.f32 %v559_v47, 0.0  ;;  %563 = vst [vmem:[%s1161_s5] sm:$0xff] %v559_v47 }
 0x15c   : > { %562 = vst [vmem:[%s279_s26] sm:$0xff] %v561_v48 }
 0x15d   : > { %952 = shalt.err (!%p949_p10)
}
 0x15e   : > { %s953_s30 = scalar_lea.hbm %s1248_s25, 128  ;;  %s957_s23 = scalar_lea.hbm %s1308_s3, 3072 }
 0x15f   : > { %p954_p11 = scmp.ne.s32.totalorder %s1248_s25, %s953_s30  ;;  %p958_p0 = scmp.lt.u32.totalorder %s1248_s25, %s1308_s3 }
 0x160   : > { %p959_p1 = scmp.lt.u32.totalorder %s957_s23, %s953_s30  ;;  %p961_p3 = scmp.lt.u32.totalorder %s953_s30, %s1248_s25 }
 0x161   : > { %p955_p12 = pnand %p954_p11, %p1121_p5 }
 0x162   : > { %p960_p2 = por %p959_p1, %p958_p0 }
 0x163   : > { %p956_p13 = pneg %p955_p12 }
 0x164   : > { %p962_p4 = por %p961_p3, %p960_p2 }
 0x166   : > { %p963_p6 = pnand %p962_p4, %p956_p13 }
 0x168   : > { %966 = shalt.err (!%p963_p6)
}
 0x169   : > { %854 = dma.vmem_to_hbm [thread:$0]  (%p1121_p5), %s1250_s20, 128, %s1248_s25, %s565_s13  }
 0x16a PF: > { %s1332_s7 = sld [smem:[#allocation10_spill]]  ;;  %s1333_s29 = sld [smem:[#allocation6_spill]] }
 0x170   : > { %p860_p7 = scmp.ge.s32.totalorder %s1332_s7, 2  ;;  %s604_s12 = sand.u32 1, %s1333_s29  }
 0x171   : > { %s605_s26 = scalar_lea.sflag [#allocation4], %s604_s12 }
 0x172   : > { %p857_p8 = pnand %p860_p7, %p1135_p9 }
 0x174   : > { %1000 = dma.done.wait (!%p857_p8), %s605_s26, 128  }
 0x175   : > { %1002 = vsyncadd (!%p857_p8), %s605_s26, 4294967168  ;;  %s18_s22 = sadd.s32 1, %s1332_s7   ;;  %s1335_s17 = sld [smem:[#allocation7_spill]] }
 0x176   : > { %p15_p10 = scmp.ge.s32.totalorder %s18_s22, 26   ;;  %s1336_s6 = sld [smem:[#allocation14_spill]] }
 0x177   : > { %s1337_s18 = sld [smem:[#allocation8_spill]]  ;;  %s1338_s19 = sld [smem:[#allocation9_spill]] }
 0x178   : > { %s1339_s20 = sld [smem:[#allocation11_spill]]  ;;  %s1340_s21 = sld [smem:[#allocation12_spill]] }
 0x179   : > { %s1341_s15 = smov %s1009_s16  ;;  %17 = sbr.rel (!%p15_p10) target bundleno = 5 (0x5), region = 89 }
 0x17b   : > { %s1342_s16 = smov %s1335_s17 }
 0x17c   : > { %s1343_s17 = smov %s1336_s6 }
 0x180   :  { %617 = vsyncpa [#allocation4], 1 }
 0x181   :  { %619 = vsyncpa [#allocation4 + $0x1], 1 }

// kernel: encoder_lstm_forward.2
= control target key start
LH: loop header
LB: loop body
LE: loop exit
PB: predicated region body
PF: predicated region fallthrough
CT: control target
= control target key end

     0   :  { %v793_v3 = vmov 0.0   ;;  %s1569_s2 = inlined_call_operand.vmem [shape: f32[128,768], index: 2, kind: input, shape index: {}]   ;;  %s1570_s0 = inlined_call_operand.vmem [shape: f32[96,128], index: 0, kind: input, shape index: {}]   ;;  %s1571_s1 = inlined_call_operand.vmem [shape: f32[96,128], index: 1, kind: input, shape index: {}]   ;;  %s1572_s3 = inlined_call_operand.vmem [shape: f32[1,768], index: 3, kind: input, shape index: {}]   ;;  %s1573_s4 = inlined_call_operand.vmem [shape: f32[96,768], index: 4, kind: output, shape index: {}]  }
   0x1   :  { %v66_v0 = vld [vmem:[%s1569_s2 + $0x8] sm:$0xff]  ;;  %v72_v1 = vld [vmem:[%s1569_s2 + $0x38] sm:$0xff]  ;;  %257 = vmatprep.mubr.f32.mxu0 %v793_v3  ;;  %394 = vmatprep.mubr.f32.mxu1 %v793_v3  ;;  %v65_v6 = vld [vmem:[%s1569_s2] sm:$0xff] }
   0x2   :  { %v68_v2 = vld [vmem:[%s1569_s2 + $0x18] sm:$0xff]  ;;  %v680_v4 = vpack.c.bf16 %v72_v1, %v66_v0  ;;  %v74_v5 = vld [vmem:[%s1569_s2 + $0x48] sm:$0xff]  ;;  %v71_v7 = vld [vmem:[%s1569_s2 + $0x30] sm:$0xff] }
   0x3   :  { %v712_v8 = vpack.c.bf16 %v74_v5, %v68_v2  ;;  %v682_v9 = vpack.c.bf16 %v71_v7, %v65_v6  ;;  %v67_v10 = vld [vmem:[%s1569_s2 + $0x10] sm:$0xff]  ;;  %v73_v11 = vld [vmem:[%s1569_s2 + $0x40] sm:$0xff]  ;;  %v78_v12 = vld [vmem:[%s1569_s2 + $0x68] sm:$0xff] }
   0x4   :  { %681 = vmatprep.subr.bf16.mxu0 %v680_v4  ;;  %v714_v13 = vpack.c.bf16 %v73_v11, %v67_v10  ;;  %v84_v14 = vld [vmem:[%s1569_s2 + $0x98] sm:$0xff]  ;;  %v86_v16 = vld [vmem:[%s1569_s2 + $0xa8] sm:$0xff]  ;;  %v77_v19 = vld [vmem:[%s1569_s2 + $0x60] sm:$0xff] }
   0x5   :  { %v80_v15 = vld [vmem:[%s1569_s2 + $0x78] sm:$0xff]  ;;  %713 = vmatprep.subr.bf16.mxu1 %v712_v8  ;;  %683 = vmatpush1.bf16.msra.mxu0 %v682_v9  ;;  %v684_v17 = vpack.c.bf16 %v84_v14, %v78_v12  ;;  %v83_v20 = vld [vmem:[%s1569_s2 + $0x90] sm:$0xff]  ;;  %v85_v23 = vld [vmem:[%s1569_s2 + $0xa0] sm:$0xff] }
   0x6   :  { %v716_v18 = vpack.c.bf16 %v86_v16, %v80_v15  ;;  %v79_v21 = vld [vmem:[%s1569_s2 + $0x70] sm:$0xff]  ;;  %715 = vmatpush1.bf16.msra.mxu1 %v714_v13  ;;  %v686_v22 = vpack.c.bf16 %v83_v20, %v77_v19  ;;  %v90_v24 = vld [vmem:[%s1569_s2 + $0xc8] sm:$0xff]  ;;  %v96_v25 = vld [vmem:[%s1569_s2 + $0xf8] sm:$0xff] }
   0x7   :  { %685 = vmatprep.subr.bf16.mxu0 %v684_v17  ;;  %v718_v26 = vpack.c.bf16 %v85_v23, %v79_v21  ;;  %v688_v27 = vpack.c.bf16 %v96_v25, %v90_v24  ;;  %v92_v28 = vld [vmem:[%s1569_s2 + $0xd8] sm:$0xff]  ;;  %v98_v29 = vld [vmem:[%s1569_s2 + $0x108] sm:$0xff]  ;;  %v89_v30 = vld [vmem:[%s1569_s2 + $0xc0] sm:$0xff] }
   0x8   :  { %717 = vmatprep.subr.bf16.mxu1 %v716_v18  ;;  %v720_v31 = vpack.c.bf16 %v98_v29, %v92_v28  ;;  %v95_v32 = vld [vmem:[%s1569_s2 + $0xf0] sm:$0xff]  ;;  %v97_v34 = vld [vmem:[%s1569_s2 + $0x100] sm:$0xff]  ;;  %v102_v36 = vld [vmem:[%s1569_s2 + $0x128] sm:$0xff] }
   0x9   :  { %v91_v33 = vld [vmem:[%s1569_s2 + $0xd0] sm:$0xff]  ;;  %687 = vmatpush1.bf16.msra.mxu0 %v686_v22  ;;  %v690_v35 = vpack.c.bf16 %v95_v32, %v89_v30  ;;  %v108_v37 = vld [vmem:[%s1569_s2 + $0x158] sm:$0xff]  ;;  %v110_v41 = vld [vmem:[%s1569_s2 + $0x168] sm:$0xff] }
   0xa   :  { %v104_v38 = vld [vmem:[%s1569_s2 + $0x138] sm:$0xff]  ;;  %719 = vmatpush1.bf16.msra.mxu1 %v718_v26  ;;  %689 = vmatprep.subr.bf16.mxu0 %v688_v27  ;;  %v722_v39 = vpack.c.bf16 %v97_v34, %v91_v33  ;;  %v692_v40 = vpack.c.bf16 %v108_v37, %v102_v36  ;;  %v101_v42 = vld [vmem:[%s1569_s2 + $0x120] sm:$0xff]  ;;  %v107_v43 = vld [vmem:[%s1569_s2 + $0x150] sm:$0xff] }
   0xb   :  { %721 = vmatprep.subr.bf16.mxu1 %v720_v31  ;;  %v724_v44 = vpack.c.bf16 %v110_v41, %v104_v38  ;;  %v103_v45 = vld [vmem:[%s1569_s2 + $0x130] sm:$0xff]  ;;  %v109_v46 = vld [vmem:[%s1569_s2 + $0x160] sm:$0xff]  ;;  %v114_v47 = vld [vmem:[%s1569_s2 + $0x188] sm:$0xff]  ;;  %v694_v51 = vpack.c.bf16 %v107_v43, %v101_v42 }
   0xc   :  { %v120_v48 = vld [vmem:[%s1569_s2 + $0x1b8] sm:$0xff]  ;;  %v122_v50 = vld [vmem:[%s1569_s2 + $0x1c8] sm:$0xff]  ;;  %v726_v52 = vpack.c.bf16 %v109_v46, %v103_v45  ;;  %v113_v54 = vld [vmem:[%s1569_s2 + $0x180] sm:$0xff] }
   0xd   :  { %v116_v49 = vld [vmem:[%s1569_s2 + $0x198] sm:$0xff]  ;;  %691 = vmatpush1.bf16.msra.mxu0 %v690_v35  ;;  %v696_v53 = vpack.c.bf16 %v120_v48, %v114_v47  ;;  %v119_v55 = vld [vmem:[%s1569_s2 + $0x1b0] sm:$0xff]  ;;  %v121_v58 = vld [vmem:[%s1569_s2 + $0x1c0] sm:$0xff] }
   0xe   :  { %723 = vmatpush1.bf16.msra.mxu1 %v722_v39  ;;  %693 = vmatprep.subr.bf16.mxu0 %v692_v40  ;;  %v115_v56 = vld [vmem:[%s1569_s2 + $0x190] sm:$0xff]  ;;  %v728_v57 = vpack.c.bf16 %v122_v50, %v116_v49  ;;  %v126_v59 = vld [vmem:[%s1569_s2 + $0x1e8] sm:$0xff]  ;;  %v132_v60 = vld [vmem:[%s1569_s2 + $0x218] sm:$0xff]  ;;  %v698_v63 = vpack.c.bf16 %v119_v55, %v113_v54 }
   0xf   :  { %725 = vmatprep.subr.bf16.mxu1 %v724_v44  ;;  %v128_v61 = vld [vmem:[%s1569_s2 + $0x1f8] sm:$0xff]  ;;  %v134_v62 = vld [vmem:[%s1569_s2 + $0x228] sm:$0xff]  ;;  %v730_v0 = vpack.c.bf16 %v121_v58, %v115_v56  ;;  %v700_v1 = vpack.c.bf16 %v132_v60, %v126_v59  ;;  %v125_v2 = vld [vmem:[%s1569_s2 + $0x1e0] sm:$0xff] }
  0x10   :  { %v131_v4 = vld [vmem:[%s1569_s2 + $0x210] sm:$0xff]  ;;  %v732_v6 = vpack.c.bf16 %v134_v62, %v128_v61  ;;  %v133_v7 = vld [vmem:[%s1569_s2 + $0x220] sm:$0xff]  ;;  %v138_v8 = vld [vmem:[%s1569_s2 + $0x248] sm:$0xff] }
  0x11   :  { %695 = vmatpush1.bf16.msra.mxu0 %v694_v51  ;;  %v127_v5 = vld [vmem:[%s1569_s2 + $0x1f0] sm:$0xff]  ;;  %v144_v9 = vld [vmem:[%s1569_s2 + $0x278] sm:$0xff]  ;;  %v146_v11 = vld [vmem:[%s1569_s2 + $0x288] sm:$0xff]  ;;  %v702_v12 = vpack.c.bf16 %v131_v4, %v125_v2 }
  0x12   :  { %727 = vmatpush1.bf16.msra.mxu1 %v726_v52  ;;  %697 = vmatprep.subr.bf16.mxu0 %v696_v53  ;;  %v140_v10 = vld [vmem:[%s1569_s2 + $0x258] sm:$0xff]  ;;  %v734_v13 = vpack.c.bf16 %v133_v7, %v127_v5  ;;  %v704_v14 = vpack.c.bf16 %v144_v9, %v138_v8  ;;  %v137_v15 = vld [vmem:[%s1569_s2 + $0x240] sm:$0xff]  ;;  %v143_v16 = vld [vmem:[%s1569_s2 + $0x270] sm:$0xff] }
  0x13   :  { %729 = vmatprep.subr.bf16.mxu1 %v728_v57  ;;  %v139_v17 = vld [vmem:[%s1569_s2 + $0x250] sm:$0xff]  ;;  %v736_v18 = vpack.c.bf16 %v146_v11, %v140_v10  ;;  %v145_v19 = vld [vmem:[%s1569_s2 + $0x280] sm:$0xff]  ;;  %v150_v20 = vld [vmem:[%s1569_s2 + $0x2a8] sm:$0xff]  ;;  %v706_v24 = vpack.c.bf16 %v143_v16, %v137_v15 }
  0x14   :  { %v156_v21 = vld [vmem:[%s1569_s2 + $0x2d8] sm:$0xff]  ;;  %v158_v23 = vld [vmem:[%s1569_s2 + $0x2e8] sm:$0xff]  ;;  %v17_v25 = vld [vmem:[%s1570_s0] sm:$0xff]  ;;  %v738_v26 = vpack.c.bf16 %v145_v19, %v139_v17 }
  0x15   :  { %699 = vmatpush1.bf16.msra.mxu0 %v698_v63  ;;  %v152_v22 = vld [vmem:[%s1569_s2 + $0x2b8] sm:$0xff]  ;;  %v708_v27 = vpack.c.bf16 %v156_v21, %v150_v20  ;;  %v149_v28 = vld [vmem:[%s1569_s2 + $0x2a0] sm:$0xff]  ;;  %v155_v29 = vld [vmem:[%s1569_s2 + $0x2d0] sm:$0xff]  ;;  %v29_v35 = vmax.f32 %v17_v25, 0.0 }
  0x16   :  { %731 = vmatpush1.bf16.msra.mxu1 %v730_v0  ;;  %701 = vmatprep.subr.bf16.mxu0 %v700_v1  ;;  %v151_v30 = vld [vmem:[%s1569_s2 + $0x2b0] sm:$0xff]  ;;  %v740_v31 = vpack.c.bf16 %v158_v23, %v152_v22  ;;  %v157_v32 = vld [vmem:[%s1569_s2 + $0x2e0] sm:$0xff]  ;;  %v70_v33 = vld [vmem:[%s1569_s2 + $0x28] sm:$0xff]  ;;  %v710_v36 = vpack.c.bf16 %v155_v29, %v149_v28 }
  0x17   :  { %733 = vmatprep.subr.bf16.mxu1 %v732_v6  ;;  %v76_v34 = vld [vmem:[%s1569_s2 + $0x58] sm:$0xff]  ;;  %v41_v37 = vld [vmem:[%s1571_s1] sm:$0xff]  ;;  %v18_v38 = vld [vmem:[%s1570_s0 + $0x8] sm:$0xff]  ;;  %v742_v39 = vpack.c.bf16 %v157_v32, %v151_v30 }
  0x18   :  { %v744_v40 = vpack.c.bf16 %v76_v34, %v70_v33  ;;  %v69_v41 = vld [vmem:[%s1569_s2 + $0x20] sm:$0xff]  ;;  %v75_v42 = vld [vmem:[%s1569_s2 + $0x50] sm:$0xff]  ;;  %v1034_v43 = vmul.f32 %v41_v37, %v29_v35  ;;  %v30_v44 = vmax.f32 %v18_v38, 0.0  ;;  %v82_v45 = vld [vmem:[%s1569_s2 + $0x88] sm:$0xff] }
  0x19   :  { %703 = vmatpush1.bf16.msra.mxu0 %v702_v12  ;;  %v88_v46 = vld [vmem:[%s1569_s2 + $0xb8] sm:$0xff]  ;;  %v746_v47 = vpack.c.bf16 %v75_v42, %v69_v41  ;;  %v42_v48 = vld [vmem:[%s1571_s1 + $0x8] sm:$0xff]  ;;  %v19_v49 = vld [vmem:[%s1570_s0 + $0x10] sm:$0xff] }
  0x1a   :  { %735 = vmatpush1.bf16.msra.mxu1 %v734_v13  ;;  %705 = vmatprep.subr.bf16.mxu0 %v704_v14  ;;  %v748_v50 = vpack.c.bf16 %v88_v46, %v82_v45  ;;  %v81_v51 = vld [vmem:[%s1569_s2 + $0x80] sm:$0xff]  ;;  %v87_v52 = vld [vmem:[%s1569_s2 + $0xb0] sm:$0xff]  ;;  %v1055_v53 = vmul.f32 %v42_v48, %v30_v44  ;;  %v31_v54 = vmax.f32 %v19_v49, 0.0  ;;  %v94_v55 = vld [vmem:[%s1569_s2 + $0xe8] sm:$0xff] }
  0x1b   :  { %737 = vmatprep.subr.bf16.mxu1 %v736_v18  ;;  %v100_v56 = vld [vmem:[%s1569_s2 + $0x118] sm:$0xff]  ;;  %v43_v57 = vld [vmem:[%s1571_s1 + $0x10] sm:$0xff]  ;;  %v750_v59 = vpack.c.bf16 %v87_v52, %v81_v51  ;;  %v93_v61 = vld [vmem:[%s1569_s2 + $0xe0] sm:$0xff] }
  0x1c   :  { %v20_v58 = vld [vmem:[%s1570_s0 + $0x18] sm:$0xff]  ;;  %v752_v60 = vpack.c.bf16 %v100_v56, %v94_v55  ;;  %v99_v62 = vld [vmem:[%s1569_s2 + $0x110] sm:$0xff]  ;;  %v1079_v63 = vmul.f32 %v43_v57, %v31_v54  ;;  %v106_v1 = vld [vmem:[%s1569_s2 + $0x148] sm:$0xff] }
  0x1d   :  { %707 = vmatpush1.bf16.msra.mxu0 %v706_v24  ;;  %v32_v0 = vmax.f32 %v20_v58, 0.0  ;;  %v112_v2 = vld [vmem:[%s1569_s2 + $0x178] sm:$0xff]  ;;  %v21_v5 = vld [vmem:[%s1570_s0 + $0x20] sm:$0xff]  ;;  %v754_v6 = vpack.c.bf16 %v99_v62, %v93_v61  ;;  %v111_v9 = vld [vmem:[%s1569_s2 + $0x170] sm:$0xff] }
  0x1e   :  { %739 = vmatpush1.bf16.msra.mxu1 %v738_v26  ;;  %709 = vmatprep.subr.bf16.mxu0 %v708_v27  ;;  %v44_v4 = vld [vmem:[%s1571_s1 + $0x18] sm:$0xff]  ;;  %v756_v7 = vpack.c.bf16 %v112_v2, %v106_v1  ;;  %v105_v8 = vld [vmem:[%s1569_s2 + $0x140] sm:$0xff]  ;;  %v33_v11 = vmax.f32 %v21_v5, 0.0  ;;  %v118_v12 = vld [vmem:[%s1569_s2 + $0x1a8] sm:$0xff] }
  0x1f   :  { %741 = vmatprep.subr.bf16.mxu1 %v740_v31  ;;  %v1103_v10 = vmul.f32 %v44_v4, %v32_v0  ;;  %v124_v13 = vld [vmem:[%s1569_s2 + $0x1d8] sm:$0xff]  ;;  %v45_v14 = vld [vmem:[%s1571_s1 + $0x20] sm:$0xff]  ;;  %v22_v15 = vld [vmem:[%s1570_s0 + $0x28] sm:$0xff]  ;;  %v758_v16 = vpack.c.bf16 %v111_v9, %v105_v8 }
  0x20   :  { %v760_v17 = vpack.c.bf16 %v124_v13, %v118_v12  ;;  %v117_v18 = vld [vmem:[%s1569_s2 + $0x1a0] sm:$0xff]  ;;  %v123_v19 = vld [vmem:[%s1569_s2 + $0x1d0] sm:$0xff]  ;;  %v1127_v20 = vmul.f32 %v45_v14, %v33_v11  ;;  %v34_v21 = vmax.f32 %v22_v15, 0.0  ;;  %v130_v22 = vld [vmem:[%s1569_s2 + $0x208] sm:$0xff] }
  0x21   :  { %711 = vmatpush1.bf16.msra.mxu0 %v710_v36  ;;  %v136_v23 = vld [vmem:[%s1569_s2 + $0x238] sm:$0xff]  ;;  %v46_v24 = vld [vmem:[%s1571_s1 + $0x28] sm:$0xff]  ;;  %v23_v25 = vld [vmem:[%s1570_s0 + $0x30] sm:$0xff]  ;;  %v762_v26 = vpack.c.bf16 %v123_v19, %v117_v18 }
  0x22   :  { %743 = vmatpush1.bf16.msra.mxu1 %v742_v39  ;;  %745 = vmatprep.subr.bf16.mxu0 %v744_v40  ;;  %v764_v27 = vpack.c.bf16 %v136_v23, %v130_v22  ;;  %v129_v28 = vld [vmem:[%s1569_s2 + $0x200] sm:$0xff]  ;;  %v135_v29 = vld [vmem:[%s1569_s2 + $0x230] sm:$0xff]  ;;  %v1151_v30 = vmul.f32 %v46_v24, %v34_v21  ;;  %v35_v31 = vmax.f32 %v23_v25, 0.0  ;;  %v142_v32 = vld [vmem:[%s1569_s2 + $0x268] sm:$0xff] }
  0x23   :  { %776 = vmatprep.subr.bf16.mxu1 %v744_v40  ;;  %v148_v33 = vld [vmem:[%s1569_s2 + $0x298] sm:$0xff]  ;;  %v47_v34 = vld [vmem:[%s1571_s1 + $0x30] sm:$0xff]  ;;  %v766_v36 = vpack.c.bf16 %v135_v29, %v129_v28  ;;  %v141_v38 = vld [vmem:[%s1569_s2 + $0x260] sm:$0xff] }
  0x24   :  { %258 = vmatmul.mubr.f32.vlgmr.msra.gmra.mrb[0].mxu0 %v1034_v43  ;;  %v24_v35 = vld [vmem:[%s1570_s0 + $0x38] sm:$0xff]  ;;  %v768_v37 = vpack.c.bf16 %v148_v33, %v142_v32  ;;  %v147_v39 = vld [vmem:[%s1569_s2 + $0x290] sm:$0xff]  ;;  %v1175_v40 = vmul.f32 %v47_v34, %v35_v31  ;;  %v154_v42 = vld [vmem:[%s1569_s2 + $0x2c8] sm:$0xff] }
  0x25   :  { %395 = vmatmul.mubr.f32.vlgmr.msra.gmra.mrb[0].mxu1 %v1034_v43  ;;  %747 = vmatpush1.bf16.msra.mxu0 %v746_v47  ;;  %v36_v41 = vmax.f32 %v24_v35, 0.0  ;;  %v160_v44 = vld [vmem:[%s1569_s2 + $0x2f8] sm:$0xff]  ;;  %v25_v46 = vld [vmem:[%s1570_s0 + $0x40] sm:$0xff]  ;;  %v26_v55 = vld [vmem:[%s1570_s0 + $0x48] sm:$0xff] }
  0x26   :  { %784 = vmatpush1.bf16.msra.mxu1 %v746_v47  ;;  %263 = vmatprep.mubr.f32.mxu0 %v793_v3  ;;  %v48_v45 = vld [vmem:[%s1571_s1 + $0x38] sm:$0xff]  ;;  %v770_v47 = vpack.c.bf16 %v147_v39, %v141_v38  ;;  %v772_v48 = vpack.c.bf16 %v160_v44, %v154_v42  ;;  %v153_v49 = vld [vmem:[%s1569_s2 + $0x2c0] sm:$0xff]  ;;  %v37_v52 = vmax.f32 %v25_v46, 0.0  ;;  %v38_v58 = vmax.f32 %v26_v55, 0.0  ;;  %v51_v0 = vld [vmem:[%s1571_s1 + $0x50] sm:$0xff] }
  0x27   :  { %400 = vmatprep.mubr.f32.mxu1 %v793_v3  ;;  %749 = vmatprep.subr.bf16.mxu0 %v748_v50  ;;  %v60_v51 = vmul.f32 %v48_v45, %v36_v41  ;;  %v49_v54 = vld [vmem:[%s1571_s1 + $0x40] sm:$0xff]  ;;  %v28_v1 = vld [vmem:[%s1570_s0 + $0x58] sm:$0xff] }
  0x28   :  { %264 = vmatmul.mubr.f32.gmra.mrb[2].mxu0 %v1055_v53  ;;  %777 = vmatprep.subr.bf16.mxu1 %v748_v50  ;;  %v159_v50 = vld [vmem:[%s1569_s2 + $0x2f0] sm:$0xff]  ;;  %v61_v57 = vmul.f32 %v49_v54, %v37_v52  ;;  %v40_v4 = vmax.f32 %v28_v1, 0.0  ;;  %v52_v5 = vld [vmem:[%s1571_s1 + $0x58] sm:$0xff] }
  0x29   :  { %401 = vmatmul.mubr.f32.gmra.mrb[2].mxu1 %v1055_v53  ;;  %269 = vmatprep.mubr.f32.mxu0 %v793_v3  ;;  %v774_v56 = vpack.c.bf16 %v159_v50, %v153_v49 }
  0x2a   :  { %406 = vmatprep.mubr.f32.mxu1 %v793_v3  ;;  %751 = vmatpush1.bf16.msra.mxu0 %v750_v59 }
  0x2b   :  { %785 = vmatpush1.bf16.msra.mxu1 %v750_v59  ;;  %753 = vmatprep.subr.bf16.mxu0 %v752_v60  ;;  %v50_v59 = vld [vmem:[%s1571_s1 + $0x48] sm:$0xff] }
  0x2c   :  { %270 = vmatmul.mubr.f32.gmra.mrb[4].mxu0 %v1079_v63  ;;  %778 = vmatprep.subr.bf16.mxu1 %v752_v60  ;;  %v27_v60 = vld [vmem:[%s1570_s0 + $0x50] sm:$0xff]  ;;  %v62_v61 = vmul.f32 %v50_v59, %v38_v58 }
  0x2d   :  { %407 = vmatmul.mubr.f32.gmra.mrb[4].mxu1 %v1079_v63  ;;  %275 = vmatprep.mubr.f32.mxu0 %v793_v3  ;;  %v39_v62 = vmax.f32 %v27_v60, 0.0 }
  0x2e   :  { %412 = vmatprep.mubr.f32.mxu1 %v793_v3  ;;  %755 = vmatpush1.bf16.msra.mxu0 %v754_v6 }
  0x2f   :  { %786 = vmatpush1.bf16.msra.mxu1 %v754_v6  ;;  %757 = vmatprep.subr.bf16.mxu0 %v756_v7  ;;  %v63_v2 = vmul.f32 %v51_v0, %v39_v62  ;;  %v64_v6 = vmul.f32 %v52_v5, %v40_v4 }
  0x30   :  { %276 = vmatmul.mubr.f32.gmra.mrb[6].mxu0 %v1103_v10  ;;  %779 = vmatprep.subr.bf16.mxu1 %v756_v7  ;;  %v1256_v7 = vld [vmem:[%s1572_s3] sm:$0x3f] }
  0x31   :  { %413 = vmatmul.mubr.f32.gmra.mrb[6].mxu1 %v1103_v10  ;;  %281 = vmatprep.mubr.f32.mxu0 %v793_v3 }
  0x32   :  { %418 = vmatprep.mubr.f32.mxu1 %v793_v3  ;;  %759 = vmatpush1.bf16.msra.mxu0 %v758_v16 }
  0x33   :  { %787 = vmatpush1.bf16.msra.mxu1 %v758_v16  ;;  %761 = vmatprep.subr.bf16.mxu0 %v760_v17 }
  0x34   :  { %282 = vmatmul.mubr.f32.gmra.mrb[8].mxu0 %v1127_v20  ;;  %780 = vmatprep.subr.bf16.mxu1 %v760_v17 }
  0x35   :  { %419 = vmatmul.mubr.f32.gmra.mrb[8].mxu1 %v1127_v20  ;;  %287 = vmatprep.mubr.f32.mxu0 %v793_v3 }
  0x36   :  { %424 = vmatprep.mubr.f32.mxu1 %v793_v3  ;;  %763 = vmatpush1.bf16.msra.mxu0 %v762_v26 }
  0x37   :  { %788 = vmatpush1.bf16.msra.mxu1 %v762_v26  ;;  %765 = vmatprep.subr.bf16.mxu0 %v764_v27 }
  0x38   :  { %288 = vmatmul.mubr.f32.gmra.mrb[10].mxu0 %v1151_v30  ;;  %781 = vmatprep.subr.bf16.mxu1 %v764_v27 }
  0x39   :  { %425 = vmatmul.mubr.f32.gmra.mrb[10].mxu1 %v1151_v30  ;;  %293 = vmatprep.mubr.f32.mxu0 %v793_v3 }
  0x3a   :  { %430 = vmatprep.mubr.f32.mxu1 %v793_v3  ;;  %767 = vmatpush1.bf16.msra.mxu0 %v766_v36 }
  0x3b   :  { %789 = vmatpush1.bf16.msra.mxu1 %v766_v36  ;;  %769 = vmatprep.subr.bf16.mxu0 %v768_v37 }
  0x3c   :  { %294 = vmatmul.mubr.f32.gmra.mrb[12].mxu0 %v1175_v40  ;;  %782 = vmatprep.subr.bf16.mxu1 %v768_v37 }
  0x3d   :  { %431 = vmatmul.mubr.f32.gmra.mrb[12].mxu1 %v1175_v40  ;;  %299 = vmatprep.mubr.f32.mxu0 %v793_v3 }
  0x3e   :  { %436 = vmatprep.mubr.f32.mxu1 %v793_v3  ;;  %771 = vmatpush1.bf16.msra.mxu0 %v770_v47 }
  0x3f   :  { %790 = vmatpush1.bf16.msra.mxu1 %v770_v47  ;;  %773 = vmatprep.subr.bf16.mxu0 %v772_v48 }
  0x40   :  { %300 = vmatmul.mubr.f32.gmra.mrb[14].mxu0 %v60_v51  ;;  %783 = vmatprep.subr.bf16.mxu1 %v772_v48 }
  0x41   :  { %437 = vmatmul.mubr.f32.gmra.mrb[14].mxu1 %v60_v51  ;;  %305 = vmatprep.mubr.f32.mxu0 %v793_v3 }
  0x42   :  { %442 = vmatprep.mubr.f32.mxu1 %v793_v3  ;;  %775 = vmatpush1.bf16.msra.mxu0 %v774_v56 }
  0x43   :  { %791 = vmatpush1.bf16.msra.mxu1 %v774_v56 }
  0x44   :  { %306 = vmatmul.mubr.f32.gmra.mrb[16].mxu0 %v61_v57 }
  0x45   :  { %443 = vmatmul.mubr.f32.gmra.mrb[16].mxu1 %v61_v57  ;;  %311 = vmatprep.mubr.f32.mxu0 %v793_v3 }
  0x46   :  { %448 = vmatprep.mubr.f32.mxu1 %v793_v3 }
  0x48   :  { %312 = vmatmul.mubr.f32.gmra.mrb[18].mxu0 %v62_v61 }
  0x49   :  { %449 = vmatmul.mubr.f32.gmra.mrb[18].mxu1 %v62_v61  ;;  %317 = vmatprep.mubr.f32.mxu0 %v793_v3 }
  0x4a   :  { %454 = vmatprep.mubr.f32.mxu1 %v793_v3 }
  0x4c   :  { %318 = vmatmul.mubr.f32.gmra.mrb[20].mxu0 %v63_v2 }
  0x4d   :  { %455 = vmatmul.mubr.f32.gmra.mrb[20].mxu1 %v63_v2  ;;  %323 = vmatprep.mubr.f32.mxu0 %v793_v3 }
  0x4e   :  { %460 = vmatprep.mubr.f32.mxu1 %v793_v3 }
  0x50   :  { %324 = vmatmul.mubr.f32.gmra.mrb[22].mxu0 %v64_v6 }
  0x51   :  { %461 = vmatmul.mubr.f32.gmra.mrb[22].mxu1 %v64_v6  ;;  %531 = vmatprep.mubr.f32.mxu0 %v793_v3 }
  0x52   :  { %567 = vmatprep.mubr.f32.mxu1 %v793_v3 }
  0x54   :  { %532 = vmatmul.mubr.f32.vlgmr.msra.gmra.mrb[24].mxu0 %v1034_v43  ;;  %v163_v43 = vlaneseq }
  0x55   :  { %568 = vmatmul.mubr.f32.vlgmr.msra.gmra.mrb[24].mxu1 %v1175_v40  ;;  %537 = vmatprep.mubr.f32.mxu0 %v793_v3 }
  0x56   :  { %573 = vmatprep.mubr.f32.mxu1 %v793_v3 }
  0x58   :  { %538 = vmatmul.mubr.f32.gmra.mrb[26].mxu0 %v1055_v53  ;;  %v1250_v53 = vshrl.u32 %v163_v43, 7 }
  0x59   :  { %574 = vmatmul.mubr.f32.gmra.mrb[26].mxu1 %v60_v51  ;;  %543 = vmatprep.mubr.f32.mxu0 %v793_v3 }
  0x5a   :  { %579 = vmatprep.mubr.f32.mxu1 %v793_v3  ;;  %v173_v8 = vsub.s32 2, %v1250_v53  ;;  %v169_v9 = vsub.s32 1, %v1250_v53 }
  0x5c   :  { %544 = vmatmul.mubr.f32.gmra.mrb[28].mxu0 %v1079_v63  ;;  %v165_v63 = vsub.s32 0, %v1250_v53  ;;  %v1265_v11 = vrot.slane %v1256_v7, %v173_v8  ;;  %v1268_v12 = vrot.slane %v1256_v7, %v169_v9 }
  0x5d   :  { %580 = vmatmul.mubr.f32.gmra.mrb[28].mxu1 %v61_v57  ;;  %549 = vmatprep.mubr.f32.mxu0 %v793_v3 }
  0x5e   :  { %585 = vmatprep.mubr.f32.mxu1 %v793_v3 }
  0x60   :  { %550 = vmatmul.mubr.f32.gmra.mrb[30].mxu0 %v1103_v10  ;;  %v177_v10 = vsub.s32 3, %v1250_v53 }
  0x61   :  { %586 = vmatmul.mubr.f32.gmra.mrb[30].mxu1 %v62_v61  ;;  %555 = vmatprep.mubr.f32.mxu0 %v793_v3 }
  0x62   :  { %591 = vmatprep.mubr.f32.mxu1 %v793_v3  ;;  %v1271_v13 = vrot.slane %v1256_v7, %v177_v10 }
  0x64   :  { %556 = vmatmul.mubr.f32.gmra.mrb[32].mxu0 %v1127_v20 }
  0x65   :  { %592 = vmatmul.mubr.f32.gmra.mrb[32].mxu1 %v63_v2  ;;  %561 = vmatprep.mubr.f32.mxu0 %v793_v3 }
  0x66   :  { %597 = vmatprep.mubr.f32.mxu1 %v793_v3  ;;  %v1262_v3 = vrot.slane %v1256_v7, %v165_v63 }
  0x68   :  { %562 = vmatmul.mubr.f32.gmra.mrb[34].mxu0 %v1151_v30 }
  0x69   :  { %598 = vmatmul.mubr.f32.gmra.mrb[34].mxu1 %v64_v6 }
  0xf7   :  { %v259_v14 = vpop.f32.mrb[0].mxu0 }
  0xf8   :  { %v260_v15 = vadd.f32 %v259_v14, %v1262_v3  ;;  %v396_v16 = vpop.f32.mrb[0].mxu1  ;;  %v261_v17 = vpop.f32.mrb[1].mxu0 }
  0xf9   :  { %v397_v18 = vadd.f32 %v396_v16, %v1265_v11  ;;  %v262_v19 = vadd.f32 %v261_v17, %v1268_v12  ;;  %v398_v20 = vpop.f32.mrb[1].mxu1 }
  0xfa   :  { %604 = vst [vmem:[%s1573_s4] sm:$0xff] %v260_v15  ;;  %v399_v21 = vadd.f32 %v398_v20, %v1271_v13 }
  0xfb   :  { %606 = vst [vmem:[%s1573_s4 + $0x10] sm:$0xff] %v397_v18  ;;  %605 = vst [vmem:[%s1573_s4 + $0x8] sm:$0xff] %v262_v19  ;;  %v265_v22 = vpop.f32.mrb[2].mxu0 }
  0xfc   :  { %607 = vst [vmem:[%s1573_s4 + $0x18] sm:$0xff] %v399_v21  ;;  %v266_v23 = vadd.f32 %v265_v22, %v1262_v3  ;;  %v402_v24 = vpop.f32.mrb[2].mxu1  ;;  %v267_v25 = vpop.f32.mrb[3].mxu0 }
  0xfd   :  { %v403_v26 = vadd.f32 %v402_v24, %v1265_v11  ;;  %v268_v27 = vadd.f32 %v267_v25, %v1268_v12  ;;  %v404_v28 = vpop.f32.mrb[3].mxu1 }
  0xfe   :  { %610 = vst [vmem:[%s1573_s4 + $0x30] sm:$0xff] %v266_v23  ;;  %v405_v29 = vadd.f32 %v404_v28, %v1271_v13 }
  0xff   :  { %612 = vst [vmem:[%s1573_s4 + $0x40] sm:$0xff] %v403_v26  ;;  %611 = vst [vmem:[%s1573_s4 + $0x38] sm:$0xff] %v268_v27  ;;  %v271_v30 = vpop.f32.mrb[4].mxu0 }
 0x100   :  { %613 = vst [vmem:[%s1573_s4 + $0x48] sm:$0xff] %v405_v29  ;;  %v272_v31 = vadd.f32 %v271_v30, %v1262_v3  ;;  %v408_v32 = vpop.f32.mrb[4].mxu1  ;;  %v273_v33 = vpop.f32.mrb[5].mxu0 }
 0x101   :  { %v409_v34 = vadd.f32 %v408_v32, %v1265_v11  ;;  %v274_v35 = vadd.f32 %v273_v33, %v1268_v12  ;;  %v410_v36 = vpop.f32.mrb[5].mxu1 }
 0x102   :  { %616 = vst [vmem:[%s1573_s4 + $0x60] sm:$0xff] %v272_v31  ;;  %v411_v37 = vadd.f32 %v410_v36, %v1271_v13 }
 0x103   :  { %618 = vst [vmem:[%s1573_s4 + $0x70] sm:$0xff] %v409_v34  ;;  %617 = vst [vmem:[%s1573_s4 + $0x68] sm:$0xff] %v274_v35  ;;  %v277_v38 = vpop.f32.mrb[6].mxu0 }
 0x104   :  { %619 = vst [vmem:[%s1573_s4 + $0x78] sm:$0xff] %v411_v37  ;;  %v278_v39 = vadd.f32 %v277_v38, %v1262_v3  ;;  %v414_v40 = vpop.f32.mrb[6].mxu1  ;;  %v279_v41 = vpop.f32.mrb[7].mxu0 }
 0x105   :  { %v415_v42 = vadd.f32 %v414_v40, %v1265_v11  ;;  %v280_v44 = vadd.f32 %v279_v41, %v1268_v12  ;;  %v416_v45 = vpop.f32.mrb[7].mxu1  ;;  %v181_v40 = vsub.s32 4, %v1250_v53 }
 0x106   :  { %622 = vst [vmem:[%s1573_s4 + $0x90] sm:$0xff] %v278_v39  ;;  %v417_v46 = vadd.f32 %v416_v45, %v1271_v13  ;;  %v185_v45 = vsub.s32 5, %v1250_v53 }
 0x107   :  { %624 = vst [vmem:[%s1573_s4 + $0xa0] sm:$0xff] %v415_v42  ;;  %623 = vst [vmem:[%s1573_s4 + $0x98] sm:$0xff] %v280_v44  ;;  %v283_v47 = vpop.f32.mrb[8].mxu0 }
 0x108   :  { %625 = vst [vmem:[%s1573_s4 + $0xa8] sm:$0xff] %v417_v46  ;;  %v284_v48 = vadd.f32 %v283_v47, %v1262_v3  ;;  %v420_v49 = vpop.f32.mrb[8].mxu1  ;;  %v285_v50 = vpop.f32.mrb[9].mxu0 }
 0x109   :  { %v421_v51 = vadd.f32 %v420_v49, %v1265_v11  ;;  %v286_v52 = vadd.f32 %v285_v50, %v1268_v12  ;;  %v422_v54 = vpop.f32.mrb[9].mxu1  ;;  %v1453_v50 = vrot.slane %v1256_v7, %v181_v40 }
 0x10a   :  { %628 = vst [vmem:[%s1573_s4 + $0xc0] sm:$0xff] %v284_v48  ;;  %v423_v55 = vadd.f32 %v422_v54, %v1271_v13 }
 0x10b   :  { %630 = vst [vmem:[%s1573_s4 + $0xd0] sm:$0xff] %v421_v51  ;;  %629 = vst [vmem:[%s1573_s4 + $0xc8] sm:$0xff] %v286_v52  ;;  %v289_v56 = vpop.f32.mrb[10].mxu0 }
 0x10c   :  { %631 = vst [vmem:[%s1573_s4 + $0xd8] sm:$0xff] %v423_v55  ;;  %v290_v57 = vadd.f32 %v289_v56, %v1262_v3  ;;  %v426_v58 = vpop.f32.mrb[10].mxu1  ;;  %v291_v59 = vpop.f32.mrb[11].mxu0  ;;  %v1458_v55 = vrot.slane %v1256_v7, %v185_v45 }
 0x10d   :  { %v427_v60 = vadd.f32 %v426_v58, %v1265_v11  ;;  %v292_v61 = vadd.f32 %v291_v59, %v1268_v12  ;;  %v428_v62 = vpop.f32.mrb[11].mxu1 }
 0x10e   :  { %634 = vst [vmem:[%s1573_s4 + $0xf0] sm:$0xff] %v290_v57  ;;  %v429_v0 = vadd.f32 %v428_v62, %v1271_v13 }
 0x10f   :  { %636 = vst [vmem:[%s1573_s4 + $0x100] sm:$0xff] %v427_v60  ;;  %635 = vst [vmem:[%s1573_s4 + $0xf8] sm:$0xff] %v292_v61  ;;  %v295_v1 = vpop.f32.mrb[12].mxu0 }
 0x110   :  { %637 = vst [vmem:[%s1573_s4 + $0x108] sm:$0xff] %v429_v0  ;;  %v296_v2 = vadd.f32 %v295_v1, %v1262_v3  ;;  %v432_v4 = vpop.f32.mrb[12].mxu1  ;;  %v297_v5 = vpop.f32.mrb[13].mxu0 }
 0x111   :  { %v433_v6 = vadd.f32 %v432_v4, %v1265_v11  ;;  %v298_v43 = vadd.f32 %v297_v5, %v1268_v12  ;;  %v434_v63 = vpop.f32.mrb[13].mxu1 }
 0x112   :  { %640 = vst [vmem:[%s1573_s4 + $0x120] sm:$0xff] %v296_v2  ;;  %v435_v8 = vadd.f32 %v434_v63, %v1271_v13 }
 0x113   :  { %642 = vst [vmem:[%s1573_s4 + $0x130] sm:$0xff] %v433_v6  ;;  %641 = vst [vmem:[%s1573_s4 + $0x128] sm:$0xff] %v298_v43  ;;  %v301_v9 = vpop.f32.mrb[14].mxu0 }
 0x114   :  { %643 = vst [vmem:[%s1573_s4 + $0x138] sm:$0xff] %v435_v8  ;;  %v302_v10 = vadd.f32 %v301_v9, %v1262_v3  ;;  %v438_v14 = vpop.f32.mrb[14].mxu1  ;;  %v303_v15 = vpop.f32.mrb[15].mxu0 }
 0x115   :  { %v439_v16 = vadd.f32 %v438_v14, %v1265_v11  ;;  %v304_v17 = vadd.f32 %v303_v15, %v1268_v12  ;;  %v440_v18 = vpop.f32.mrb[15].mxu1 }
 0x116   :  { %646 = vst [vmem:[%s1573_s4 + $0x150] sm:$0xff] %v302_v10  ;;  %v441_v19 = vadd.f32 %v440_v18, %v1271_v13 }
 0x117   :  { %648 = vst [vmem:[%s1573_s4 + $0x160] sm:$0xff] %v439_v16  ;;  %647 = vst [vmem:[%s1573_s4 + $0x158] sm:$0xff] %v304_v17  ;;  %v307_v20 = vpop.f32.mrb[16].mxu0 }
 0x118   :  { %649 = vst [vmem:[%s1573_s4 + $0x168] sm:$0xff] %v441_v19  ;;  %v308_v21 = vadd.f32 %v307_v20, %v1262_v3  ;;  %v444_v22 = vpop.f32.mrb[16].mxu1  ;;  %v309_v23 = vpop.f32.mrb[17].mxu0 }
 0x119   :  { %v445_v24 = vadd.f32 %v444_v22, %v1265_v11  ;;  %v310_v25 = vadd.f32 %v309_v23, %v1268_v12  ;;  %v446_v26 = vpop.f32.mrb[17].mxu1 }
 0x11a   :  { %652 = vst [vmem:[%s1573_s4 + $0x180] sm:$0xff] %v308_v21  ;;  %v447_v27 = vadd.f32 %v446_v26, %v1271_v13 }
 0x11b   :  { %654 = vst [vmem:[%s1573_s4 + $0x190] sm:$0xff] %v445_v24  ;;  %653 = vst [vmem:[%s1573_s4 + $0x188] sm:$0xff] %v310_v25  ;;  %v313_v28 = vpop.f32.mrb[18].mxu0 }
 0x11c   :  { %655 = vst [vmem:[%s1573_s4 + $0x198] sm:$0xff] %v447_v27  ;;  %v314_v29 = vadd.f32 %v313_v28, %v1262_v3  ;;  %v450_v30 = vpop.f32.mrb[18].mxu1  ;;  %v315_v31 = vpop.f32.mrb[19].mxu0 }
 0x11d   :  { %v451_v32 = vadd.f32 %v450_v30, %v1265_v11  ;;  %v316_v33 = vadd.f32 %v315_v31, %v1268_v12  ;;  %v452_v34 = vpop.f32.mrb[19].mxu1 }
 0x11e   :  { %658 = vst [vmem:[%s1573_s4 + $0x1b0] sm:$0xff] %v314_v29  ;;  %v453_v35 = vadd.f32 %v452_v34, %v1271_v13 }
 0x11f   :  { %660 = vst [vmem:[%s1573_s4 + $0x1c0] sm:$0xff] %v451_v32  ;;  %659 = vst [vmem:[%s1573_s4 + $0x1b8] sm:$0xff] %v316_v33  ;;  %v319_v36 = vpop.f32.mrb[20].mxu0 }
 0x120   :  { %661 = vst [vmem:[%s1573_s4 + $0x1c8] sm:$0xff] %v453_v35  ;;  %v320_v37 = vadd.f32 %v319_v36, %v1262_v3  ;;  %v456_v38 = vpop.f32.mrb[20].mxu1  ;;  %v321_v39 = vpop.f32.mrb[21].mxu0 }
 0x121   :  { %v457_v41 = vadd.f32 %v456_v38, %v1265_v11  ;;  %v322_v42 = vadd.f32 %v321_v39, %v1268_v12  ;;  %v458_v44 = vpop.f32.mrb[21].mxu1 }
 0x122   :  { %664 = vst [vmem:[%s1573_s4 + $0x1e0] sm:$0xff] %v320_v37  ;;  %v459_v46 = vadd.f32 %v458_v44, %v1271_v13 }
 0x123   :  { %666 = vst [vmem:[%s1573_s4 + $0x1f0] sm:$0xff] %v457_v41  ;;  %665 = vst [vmem:[%s1573_s4 + $0x1e8] sm:$0xff] %v322_v42  ;;  %v325_v47 = vpop.f32.mrb[22].mxu0 }
 0x124   :  { %667 = vst [vmem:[%s1573_s4 + $0x1f8] sm:$0xff] %v459_v46  ;;  %v326_v53 = vadd.f32 %v325_v47, %v1262_v3  ;;  %v462_v48 = vpop.f32.mrb[22].mxu1  ;;  %v327_v49 = vpop.f32.mrb[23].mxu0 }
 0x125   :  { %v463_v51 = vadd.f32 %v462_v48, %v1265_v11  ;;  %v328_v52 = vadd.f32 %v327_v49, %v1268_v12  ;;  %v464_v54 = vpop.f32.mrb[23].mxu1 }
 0x126   :  { %670 = vst [vmem:[%s1573_s4 + $0x210] sm:$0xff] %v326_v53  ;;  %v465_v56 = vadd.f32 %v464_v54, %v1271_v13 }
 0x127   :  { %672 = vst [vmem:[%s1573_s4 + $0x220] sm:$0xff] %v463_v51  ;;  %671 = vst [vmem:[%s1573_s4 + $0x218] sm:$0xff] %v328_v52  ;;  %v533_v3 = vpop.f32.mrb[24].mxu0 }
 0x128   :  { %673 = vst [vmem:[%s1573_s4 + $0x228] sm:$0xff] %v465_v56  ;;  %v534_v7 = vadd.f32 %v533_v3, %v1453_v50  ;;  %v569_v11 = vpop.f32.mrb[24].mxu1  ;;  %v535_v12 = vpop.f32.mrb[25].mxu0 }
 0x129   :  { %v570_v57 = vadd.f32 %v569_v11, %v1453_v50  ;;  %v536_v13 = vadd.f32 %v535_v12, %v1458_v55  ;;  %v571_v58 = vpop.f32.mrb[25].mxu1 }
 0x12a   :  { %608 = vst [vmem:[%s1573_s4 + $0x20] sm:$0xff] %v534_v7  ;;  %v572_v59 = vadd.f32 %v571_v58, %v1458_v55 }
 0x12b   :  { %644 = vst [vmem:[%s1573_s4 + $0x140] sm:$0xff] %v570_v57  ;;  %609 = vst [vmem:[%s1573_s4 + $0x28] sm:$0xff] %v536_v13  ;;  %v539_v60 = vpop.f32.mrb[26].mxu0 }
 0x12c   :  { %645 = vst [vmem:[%s1573_s4 + $0x148] sm:$0xff] %v572_v59  ;;  %v540_v61 = vadd.f32 %v539_v60, %v1453_v50  ;;  %v575_v62 = vpop.f32.mrb[26].mxu1  ;;  %v541_v0 = vpop.f32.mrb[27].mxu0 }
 0x12d   :  { %v576_v1 = vadd.f32 %v575_v62, %v1453_v50  ;;  %v542_v2 = vadd.f32 %v541_v0, %v1458_v55  ;;  %v577_v4 = vpop.f32.mrb[27].mxu1 }
 0x12e   :  { %614 = vst [vmem:[%s1573_s4 + $0x50] sm:$0xff] %v540_v61  ;;  %v578_v5 = vadd.f32 %v577_v4, %v1458_v55 }
 0x12f   :  { %650 = vst [vmem:[%s1573_s4 + $0x170] sm:$0xff] %v576_v1  ;;  %615 = vst [vmem:[%s1573_s4 + $0x58] sm:$0xff] %v542_v2  ;;  %v545_v6 = vpop.f32.mrb[28].mxu0 }
 0x130   :  { %651 = vst [vmem:[%s1573_s4 + $0x178] sm:$0xff] %v578_v5  ;;  %v546_v43 = vadd.f32 %v545_v6, %v1453_v50  ;;  %v581_v63 = vpop.f32.mrb[28].mxu1  ;;  %v547_v8 = vpop.f32.mrb[29].mxu0 }
 0x131   :  { %v582_v9 = vadd.f32 %v581_v63, %v1453_v50  ;;  %v548_v10 = vadd.f32 %v547_v8, %v1458_v55  ;;  %v583_v14 = vpop.f32.mrb[29].mxu1 }
 0x132   :  { %620 = vst [vmem:[%s1573_s4 + $0x80] sm:$0xff] %v546_v43  ;;  %v584_v15 = vadd.f32 %v583_v14, %v1458_v55 }
 0x133   :  { %656 = vst [vmem:[%s1573_s4 + $0x1a0] sm:$0xff] %v582_v9  ;;  %621 = vst [vmem:[%s1573_s4 + $0x88] sm:$0xff] %v548_v10  ;;  %v551_v16 = vpop.f32.mrb[30].mxu0 }
 0x134   :  { %657 = vst [vmem:[%s1573_s4 + $0x1a8] sm:$0xff] %v584_v15  ;;  %v552_v17 = vadd.f32 %v551_v16, %v1453_v50  ;;  %v587_v18 = vpop.f32.mrb[30].mxu1  ;;  %v553_v19 = vpop.f32.mrb[31].mxu0 }
 0x135   :  { %v588_v20 = vadd.f32 %v587_v18, %v1453_v50  ;;  %v554_v21 = vadd.f32 %v553_v19, %v1458_v55  ;;  %v589_v22 = vpop.f32.mrb[31].mxu1 }
 0x136   :  { %626 = vst [vmem:[%s1573_s4 + $0xb0] sm:$0xff] %v552_v17  ;;  %v590_v23 = vadd.f32 %v589_v22, %v1458_v55 }
 0x137   :  { %662 = vst [vmem:[%s1573_s4 + $0x1d0] sm:$0xff] %v588_v20  ;;  %627 = vst [vmem:[%s1573_s4 + $0xb8] sm:$0xff] %v554_v21  ;;  %v557_v24 = vpop.f32.mrb[32].mxu0 }
 0x138   :  { %663 = vst [vmem:[%s1573_s4 + $0x1d8] sm:$0xff] %v590_v23  ;;  %v558_v25 = vadd.f32 %v557_v24, %v1453_v50  ;;  %v593_v26 = vpop.f32.mrb[32].mxu1  ;;  %v559_v27 = vpop.f32.mrb[33].mxu0 }
 0x139   :  { %v594_v28 = vadd.f32 %v593_v26, %v1453_v50  ;;  %v560_v29 = vadd.f32 %v559_v27, %v1458_v55  ;;  %v595_v30 = vpop.f32.mrb[33].mxu1 }
 0x13a   :  { %632 = vst [vmem:[%s1573_s4 + $0xe0] sm:$0xff] %v558_v25  ;;  %v596_v31 = vadd.f32 %v595_v30, %v1458_v55 }
 0x13b   :  { %668 = vst [vmem:[%s1573_s4 + $0x200] sm:$0xff] %v594_v28  ;;  %633 = vst [vmem:[%s1573_s4 + $0xe8] sm:$0xff] %v560_v29  ;;  %v563_v32 = vpop.f32.mrb[34].mxu0 }
 0x13c   :  { %669 = vst [vmem:[%s1573_s4 + $0x208] sm:$0xff] %v596_v31  ;;  %v564_v33 = vadd.f32 %v563_v32, %v1453_v50  ;;  %v599_v34 = vpop.f32.mrb[34].mxu1  ;;  %v565_v35 = vpop.f32.mrb[35].mxu0 }
 0x13d   :  { %v600_v36 = vadd.f32 %v599_v34, %v1453_v50  ;;  %v566_v37 = vadd.f32 %v565_v35, %v1458_v55  ;;  %v601_v38 = vpop.f32.mrb[35].mxu1 }
 0x13e   :  { %638 = vst [vmem:[%s1573_s4 + $0x110] sm:$0xff] %v564_v33  ;;  %v602_v39 = vadd.f32 %v601_v38, %v1458_v55 }
 0x13f   :  { %674 = vst [vmem:[%s1573_s4 + $0x230] sm:$0xff] %v600_v36  ;;  %639 = vst [vmem:[%s1573_s4 + $0x118] sm:$0xff] %v566_v37 }
 0x140   :  { %675 = vst [vmem:[%s1573_s4 + $0x238] sm:$0xff] %v602_v39 }

</bundles_post_ra>
